<compile_context>
chip_gen: v7x
topology: tpu7x:2x2x1
jax: 0.10.0
libtpu: 0.0.40
codegen_flags: <defaults>
</compile_context>

<pallas_src>
import jax
import jax.numpy as jnp
from jax.experimental import pallas as pl
from jax.experimental.pallas import tpu as pltpu


def _round_up(x, m):
    return (x + m - 1) // m * m


def _pick_tm(M, tm_max=512):
    """M-tile: aim for >=2 grid steps (v7x dual-TC), multiple of 8, <= tm_max."""
    half = -(-M // 2)  # cdiv(M, 2)
    return max(8, min(tm_max, _round_up(half, 8)))


# ----------------------------- Pallas kernel ------------------------------ #
def _matmul_bias_relu_kernel(p_ref, w_ref, b_ref, o_ref):
    # p_ref: (tm, Kp) bf16 im2col patches tile
    # w_ref: (Kp, Cp) bf16 conv weights with the BN scale pre-folded along Cout
    # b_ref: (1, Cp)  f32  folded bias (conv bias + BN shift)
    acc = jnp.dot(p_ref[...], w_ref[...], preferred_element_type=jnp.float32)
    o_ref[...] = jnp.maximum(acc + b_ref[...], 0.0).astype(o_ref.dtype)


def conv_bn_relu(x_nhwc, w_kkio, conv_b, gamma, beta, run_mean, run_var,
                 stride, eps=1e-5, tm_max=512):
    """Conv2d(k, stride, padding=(k-1)//2, bias) + BatchNorm2d(eval) + ReLU.

    x_nhwc : (N, H, W, Cin)   bf16 activations
    w_kkio : (k, k, Cin, Cout) f32  (== PyTorch weight.transpose(2, 3, 1, 0))
    returns: (N, Ho, Wo, Cout) bf16
    """
    N, H, W, Cin = x_nhwc.shape
    k = w_kkio.shape[0]
    Cout = w_kkio.shape[-1]
    pad = (k - 1) // 2
    Ho = (H + 2 * pad - k) // stride + 1
    Wo = (W + 2 * pad - k) // stride + 1

    # Fold conv bias + inference BatchNorm (running-stat / eval semantics):
    #   y = ((conv(x,W)+b) - mean) * gamma / sqrt(var+eps) + beta
    #     = conv(x, W*s) + ((b - mean)*s + beta),   s = gamma / sqrt(var+eps)
    s = gamma / jnp.sqrt(run_var + eps)
    w_folded = (w_kkio * s).astype(jnp.bfloat16)
    bias_eff = ((conv_b - run_mean) * s + beta).astype(jnp.float32)

    # im2col glue (patch order = (dy, dx, cin), matching the weight reshape).
    # Under jit + allow_input_fusion this chain fuses into the pallas_call
    # operand instead of writing a k^2-expanded copy of the activation to HBM.
    xp = jnp.pad(x_nhwc, ((0, 0), (pad, pad), (pad, pad), (0, 0)))
    cols = []
    for dy in range(k):
        for dx in range(k):
            cols.append(
                xp[:, dy:dy + stride * (Ho - 1) + 1:stride,
                      dx:dx + stride * (Wo - 1) + 1:stride, :])
    patches = jnp.concatenate(cols, axis=-1).reshape(N * Ho * Wo, k * k * Cin)
    wm = w_folded.reshape(k * k * Cin, Cout)

    M, K = patches.shape
    tm = _pick_tm(M, tm_max)
    Mp = _round_up(M, tm)
    Kp = _round_up(K, 128)
    Cp = _round_up(Cout, 128)

    p_pad = jnp.pad(patches, ((0, Mp - M), (0, Kp - K)))
    w_pad = jnp.pad(wm, ((0, Kp - K), (0, Cp - Cout)))
    b_pad = jnp.pad(bias_eff[None, :], ((0, 0), (0, Cp - Cout)))

    # VMEM budget for the chosen tiles: double-buffered patches + output tiles,
    # (possibly double-buffered) resident weight and bias blocks, bf16 operands.
    vmem_need = (2 * tm * Kp * 2          # patches tiles
                 + 2 * Kp * Cp * 2        # weight block
                 + 2 * Cp * 4             # bias block
                 + 2 * tm * Cp * 2)       # output tiles
    vmem_limit = int(min(max(2 * vmem_need, 32 * 2 ** 20), 48 * 2 ** 20))

    out = pl.pallas_call(
        _matmul_bias_relu_kernel,
        out_shape=jax.ShapeDtypeStruct((Mp, Cp), jnp.bfloat16),
        grid_spec=pltpu.PrefetchScalarGridSpec(
            num_scalar_prefetch=0,
            grid=(Mp // tm,),
            in_specs=[
                pl.BlockSpec((tm, Kp), lambda i: (i, 0)),
                # weight / bias: grid-invariant blocks -> fetched once, resident.
                pl.BlockSpec((Kp, Cp), lambda i: (0, 0)),
                pl.BlockSpec((1, Cp), lambda i: (0, 0)),
            ],
            out_specs=pl.BlockSpec((tm, Cp), lambda i: (i, 0)),
        ),
        compiler_params=pltpu.CompilerParams(
            dimension_semantics=("parallel",),
            allow_input_fusion=(True, False, False),
            vmem_limit_bytes=vmem_limit,
        ),
    )(p_pad, w_pad, b_pad)

    return out[:M, :Cout].reshape(N, Ho, Wo, Cout)


# --------------------------- parameter creation ---------------------------- #
def init_single_conv_params(key, cin, cout, k):
    k1, k2 = jax.random.split(key)
    fan_in = float(cin * k * k)
    bound = fan_in ** -0.5                       # matches nn.Conv2d default init
    w = jax.random.uniform(k1, (k, k, cin, cout), jnp.float32, -bound, bound)
    b = jax.random.uniform(k2, (cout,), jnp.float32, -bound, bound)
    return dict(w=w, b=b,
                gamma=jnp.ones((cout,), jnp.float32),   # BatchNorm2d defaults
                beta=jnp.zeros((cout,), jnp.float32),
                rm=jnp.zeros((cout,), jnp.float32),
                rv=jnp.ones((cout,), jnp.float32))


def init_unet_encoder_params(key, n_stages, in_channels, out_channels,
                             kernel_sizes, n_conv_per_stage=2):
    params = []
    cin = in_channels
    for s in range(n_stages):
        stage = []
        for ci in range(n_conv_per_stage):
            key, sub = jax.random.split(key)
            c_in = cin if ci == 0 else out_channels[s]
            stage.append(init_single_conv_params(sub, c_in, out_channels[s],
                                                 kernel_sizes[s]))
        params.append(stage)
        cin = out_channels[s]
    return params


# ------------------------------ forward pass ------------------------------- #
def unet_encoder_forward(x_nchw, params, strides):
    """Per-stage skips in NCHW f32 (PyTorch convention); NHWC/bf16 internally."""
    x = jnp.transpose(x_nchw, (0, 2, 3, 1)).astype(jnp.bfloat16)   # -> NHWC bf16
    skips = []
    for s, stage in enumerate(params):
        for ci, p in enumerate(stage):
            stride = strides[s] if ci == 0 else 1
            x = conv_bn_relu(x, p["w"], p["b"], p["gamma"], p["beta"],
                             p["rm"], p["rv"], stride)
            # Dropout2d(drop_rate=0) is the identity -> omitted.
        skips.append(jnp.transpose(x, (0, 3, 1, 2)).astype(jnp.float32))
    return skips


# --------------------- pure-JAX reference (correctness) --------------------- #
def _reference_forward(x_nchw, params, strides, eps=1e-5):
    x = jnp.transpose(x_nchw, (0, 2, 3, 1)).astype(jnp.float32)
    skips = []
    for s, stage in enumerate(params):
        for ci, p in enumerate(stage):
            stride = strides[s] if ci == 0 else 1
            k = p["w"].shape[0]
            pad = (k - 1) // 2
            y = jax.lax.conv_general_dilated(
                x, p["w"], window_strides=(stride, stride),
                padding=[(pad, pad), (pad, pad)],
                dimension_numbers=("NHWC", "HWIO", "NHWC"))
            y = y + p["b"]
            y = (y - p["rm"]) / jnp.sqrt(p["rv"] + eps) * p["gamma"] + p["beta"]
            x = jnp.maximum(y, 0.0)
        skips.append(jnp.transpose(x, (0, 3, 1, 2)))
    return skips


# ----------------------------------- main ----------------------------------- #
if __name__ == "__main__":
    # Small, module-consistent config:
    n_stages = 3
    in_channels = 4
    out_channels = [8, 16, 32]
    kernel_sizes = [3, 3, 3]
    strides = [1, 2, 2]

    key = jax.random.PRNGKey(0)
    kx, kp = jax.random.split(key)
    x = jax.random.normal(kx, (2, in_channels, 16, 16), jnp.float32)  # NCHW

    params = init_unet_encoder_params(kp, n_stages, in_channels,
                                      out_channels, kernel_sizes)

    # jit the whole forward so the im2col glue can fuse into the pallas_call.
    fwd = jax.jit(lambda xx, pp: unet_encoder_forward(xx, pp, tuple(strides)))
    skips = fwd(x, params)
    skips = [jax.block_until_ready(s) for s in skips]

    expected = [(2, 8, 16, 16), (2, 16, 8, 8), (2, 32, 4, 4)]
    assert [tuple(s.shape) for s in skips] == expected, \
        [tuple(s.shape) for s in skips]
    assert all(bool(jnp.all(s >= 0)) for s in skips)          # ReLU outputs

    # Numerical cross-check vs. a pure-JAX f32 reference (bf16 tolerance).
    ref = _reference_forward(x, params, strides)
    for got, want in zip(skips, ref):
        err = float(jnp.max(jnp.abs(got - want)))
        assert err < 1e-1, err

    print("KERNEL_OK")
</pallas_src>

<mosaic_0001>
module attributes {stable_mosaic.version = 11 : i64} {
  func.func @_matmul_bias_relu_kernel(%arg0: i32, %arg1: memref<256x128xbf16, #tpu.memory_space<vmem>>, %arg2: memref<128x128xbf16, #tpu.memory_space<vmem>>, %arg3: memref<1x128xf32, #tpu.memory_space<vmem>>, %arg4: memref<256x128xbf16, #tpu.memory_space<vmem>>) attributes {dimension_semantics = [#tpu.dimension_semantics<parallel>], iteration_bounds = array<i64: 2>, scalar_prefetch = 0 : i64, scratch_operands = 0 : i64, tpu.core_type = #tpu.core_type<tc>, window_params = [{transform_indices = @transform_0, window_bounds = array<i64: 256, 128>}, {pipeline_mode = #tpu.pipeline_mode<synchronous>, transform_indices = @transform_1, window_bounds = array<i64: 128, 128>}, {pipeline_mode = #tpu.pipeline_mode<synchronous>, transform_indices = @transform_2, window_bounds = array<i64: 1, 128>}, {transform_indices = @transform_3, window_bounds = array<i64: 256, 128>}]} {
    %c0 = arith.constant 0 : index
    %c0_0 = arith.constant 0 : index
    %0 = vector.load %arg1[%c0, %c0_0] : memref<256x128xbf16, #tpu.memory_space<vmem>>, vector<256x128xbf16>
    %c0_1 = arith.constant 0 : index
    %c0_2 = arith.constant 0 : index
    %1 = vector.load %arg2[%c0_1, %c0_2] : memref<128x128xbf16, #tpu.memory_space<vmem>>, vector<128x128xbf16>
    %cst = arith.constant dense<0.000000e+00> : vector<256x128xf32>
    %2 = tpu.matmul %0, %1, %cst {dimension_numbers = #tpu.dot_dimension_numbers<[1], [0], [0], [1], [0, 0, 1, 1], [], []>} : vector<256x128xbf16>, vector<128x128xbf16>, vector<256x128xf32> -> vector<256x128xf32>
    %c0_3 = arith.constant 0 : index
    %c0_4 = arith.constant 0 : index
    %3 = vector.load %arg3[%c0_3, %c0_4] : memref<1x128xf32, #tpu.memory_space<vmem>>, vector<1x128xf32>
    %4 = vector.broadcast %3 : vector<1x128xf32> to vector<256x128xf32>
    %5 = arith.addf %2, %4 : vector<256x128xf32>
    %cst_5 = arith.constant 0.000000e+00 : f32
    %6 = vector.broadcast %cst_5 : f32 to vector<256x128xf32>
    %7 = arith.maximumf %5, %6 : vector<256x128xf32>
    %8 = arith.truncf %7 : vector<256x128xf32> to vector<256x128xbf16>
    %c0_6 = arith.constant 0 : index
    %c0_7 = arith.constant 0 : index
    %9 = vector.load %arg4[%c0_6, %c0_7] : memref<256x128xbf16, #tpu.memory_space<vmem>>, vector<256x128xbf16>
    tpu.vector_store %arg4[%c0_6, %c0_7], %8 {strides = array<i32>} : memref<256x128xbf16, #tpu.memory_space<vmem>>, vector<256x128xbf16>,
    return
  }
  func.func @transform_0(%arg0: i32) -> (i32, i32) {
    %c0_i32 = arith.constant 0 : i32
    %c0_i32_0 = arith.constant 0 : i32
    return %arg0, %c0_i32 : i32, i32
  }
  func.func @transform_1(%arg0: i32) -> (i32, i32) {
    %c0_i32 = arith.constant 0 : i32
    %c0_i32_0 = arith.constant 0 : i32
    %c0_i32_1 = arith.constant 0 : i32
    return %c0_i32, %c0_i32_0 : i32, i32
  }
  func.func @transform_2(%arg0: i32) -> (i32, i32) {
    %c0_i32 = arith.constant 0 : i32
    %c0_i32_0 = arith.constant 0 : i32
    %c0_i32_1 = arith.constant 0 : i32
    return %c0_i32, %c0_i32_0 : i32, i32
  }
  func.func @transform_3(%arg0: i32) -> (i32, i32) {
    %c0_i32 = arith.constant 0 : i32
    %c0_i32_0 = arith.constant 0 : i32
    return %arg0, %c0_i32 : i32, i32
  }
}

module attributes {stable_mosaic.version = 11 : i64} {
  func.func @_matmul_bias_relu_kernel(%arg0: i32, %arg1: memref<256x128xbf16, #tpu.memory_space<vmem>>, %arg2: memref<128x128xbf16, #tpu.memory_space<vmem>>, %arg3: memref<1x128xf32, #tpu.memory_space<vmem>>, %arg4: memref<256x128xbf16, #tpu.memory_space<vmem>>) attributes {dimension_semantics = [#tpu.dimension_semantics<parallel>], iteration_bounds = array<i64: 2>, scalar_prefetch = 0 : i64, scratch_operands = 0 : i64, tpu.core_type = #tpu.core_type<tc>, window_params = [{transform_indices = @transform_0, window_bounds = array<i64: 256, 128>}, {pipeline_mode = #tpu.pipeline_mode<synchronous>, transform_indices = @transform_1, window_bounds = array<i64: 128, 128>}, {pipeline_mode = #tpu.pipeline_mode<synchronous>, transform_indices = @transform_2, window_bounds = array<i64: 1, 128>}, {transform_indices = @transform_3, window_bounds = array<i64: 256, 128>}]} {
    %c0 = arith.constant 0 : index
    %c0_0 = arith.constant 0 : index
    %0 = vector.load %arg1[%c0, %c0_0] : memref<256x128xbf16, #tpu.memory_space<vmem>>, vector<256x128xbf16>
    %c0_1 = arith.constant 0 : index
    %c0_2 = arith.constant 0 : index
    %1 = vector.load %arg2[%c0_1, %c0_2] : memref<128x128xbf16, #tpu.memory_space<vmem>>, vector<128x128xbf16>
    %cst = arith.constant dense<0.000000e+00> : vector<256x128xf32>
    %2 = tpu.matmul %0, %1, %cst {dimension_numbers = #tpu.dot_dimension_numbers<[1], [0], [0], [1], [0, 0, 1, 1], [], []>} : vector<256x128xbf16>, vector<128x128xbf16>, vector<256x128xf32> -> vector<256x128xf32>
    %c0_3 = arith.constant 0 : index
    %c0_4 = arith.constant 0 : index
    %3 = vector.load %arg3[%c0_3, %c0_4] : memref<1x128xf32, #tpu.memory_space<vmem>>, vector<1x128xf32>
    %4 = vector.broadcast %3 : vector<1x128xf32> to vector<256x128xf32>
    %5 = arith.addf %2, %4 : vector<256x128xf32>
    %cst_5 = arith.constant 0.000000e+00 : f32
    %6 = vector.broadcast %cst_5 : f32 to vector<256x128xf32>
    %7 = arith.maximumf %5, %6 : vector<256x128xf32>
    %8 = arith.truncf %7 : vector<256x128xf32> to vector<256x128xbf16>
    %c0_6 = arith.constant 0 : index
    %c0_7 = arith.constant 0 : index
    %9 = vector.load %arg4[%c0_6, %c0_7] : memref<256x128xbf16, #tpu.memory_space<vmem>>, vector<256x128xbf16>
    tpu.vector_store %arg4[%c0_6, %c0_7], %8 {strides = array<i32>} : memref<256x128xbf16, #tpu.memory_space<vmem>>, vector<256x128xbf16>,
    return
  }
  func.func @transform_0(%arg0: i32) -> (i32, i32) {
    %c0_i32 = arith.constant 0 : i32
    %c0_i32_0 = arith.constant 0 : i32
    return %arg0, %c0_i32 : i32, i32
  }
  func.func @transform_1(%arg0: i32) -> (i32, i32) {
    %c0_i32 = arith.constant 0 : i32
    %c0_i32_0 = arith.constant 0 : i32
    %c0_i32_1 = arith.constant 0 : i32
    return %c0_i32, %c0_i32_0 : i32, i32
  }
  func.func @transform_2(%arg0: i32) -> (i32, i32) {
    %c0_i32 = arith.constant 0 : i32
    %c0_i32_0 = arith.constant 0 : i32
    %c0_i32_1 = arith.constant 0 : i32
    return %c0_i32, %c0_i32_0 : i32, i32
  }
  func.func @transform_3(%arg0: i32) -> (i32, i32) {
    %c0_i32 = arith.constant 0 : i32
    %c0_i32_0 = arith.constant 0 : i32
    return %arg0, %c0_i32 : i32, i32
  }
}

module attributes {stable_mosaic.version = 11 : i64} {
  func.func @_matmul_bias_relu_kernel(%arg0: i32, %arg1: memref<64x128xbf16, #tpu.memory_space<vmem>>, %arg2: memref<128x128xbf16, #tpu.memory_space<vmem>>, %arg3: memref<1x128xf32, #tpu.memory_space<vmem>>, %arg4: memref<64x128xbf16, #tpu.memory_space<vmem>>) attributes {dimension_semantics = [#tpu.dimension_semantics<parallel>], iteration_bounds = array<i64: 2>, scalar_prefetch = 0 : i64, scratch_operands = 0 : i64, tpu.core_type = #tpu.core_type<tc>, window_params = [{transform_indices = @transform_0, window_bounds = array<i64: 64, 128>}, {pipeline_mode = #tpu.pipeline_mode<synchronous>, transform_indices = @transform_1, window_bounds = array<i64: 128, 128>}, {pipeline_mode = #tpu.pipeline_mode<synchronous>, transform_indices = @transform_2, window_bounds = array<i64: 1, 128>}, {transform_indices = @transform_3, window_bounds = array<i64: 64, 128>}]} {
    %c0 = arith.constant 0 : index
    %c0_0 = arith.constant 0 : index
    %0 = vector.load %arg1[%c0, %c0_0] : memref<64x128xbf16, #tpu.memory_space<vmem>>, vector<64x128xbf16>
    %c0_1 = arith.constant 0 : index
    %c0_2 = arith.constant 0 : index
    %1 = vector.load %arg2[%c0_1, %c0_2] : memref<128x128xbf16, #tpu.memory_space<vmem>>, vector<128x128xbf16>
    %cst = arith.constant dense<0.000000e+00> : vector<64x128xf32>
    %2 = tpu.matmul %0, %1, %cst {dimension_numbers = #tpu.dot_dimension_numbers<[1], [0], [0], [1], [0, 0, 1, 1], [], []>} : vector<64x128xbf16>, vector<128x128xbf16>, vector<64x128xf32> -> vector<64x128xf32>
    %c0_3 = arith.constant 0 : index
    %c0_4 = arith.constant 0 : index
    %3 = vector.load %arg3[%c0_3, %c0_4] : memref<1x128xf32, #tpu.memory_space<vmem>>, vector<1x128xf32>
    %4 = vector.broadcast %3 : vector<1x128xf32> to vector<64x128xf32>
    %5 = arith.addf %2, %4 : vector<64x128xf32>
    %cst_5 = arith.constant 0.000000e+00 : f32
    %6 = vector.broadcast %cst_5 : f32 to vector<64x128xf32>
    %7 = arith.maximumf %5, %6 : vector<64x128xf32>
    %8 = arith.truncf %7 : vector<64x128xf32> to vector<64x128xbf16>
    %c0_6 = arith.constant 0 : index
    %c0_7 = arith.constant 0 : index
    %9 = vector.load %arg4[%c0_6, %c0_7] : memref<64x128xbf16, #tpu.memory_space<vmem>>, vector<64x128xbf16>
    tpu.vector_store %arg4[%c0_6, %c0_7], %8 {strides = array<i32>} : memref<64x128xbf16, #tpu.memory_space<vmem>>, vector<64x128xbf16>,
    return
  }
  func.func @transform_0(%arg0: i32) -> (i32, i32) {
    %c0_i32 = arith.constant 0 : i32
    %c0_i32_0 = arith.constant 0 : i32
    return %arg0, %c0_i32 : i32, i32
  }
  func.func @transform_1(%arg0: i32) -> (i32, i32) {
    %c0_i32 = arith.constant 0 : i32
    %c0_i32_0 = arith.constant 0 : i32
    %c0_i32_1 = arith.constant 0 : i32
    return %c0_i32, %c0_i32_0 : i32, i32
  }
  func.func @transform_2(%arg0: i32) -> (i32, i32) {
    %c0_i32 = arith.constant 0 : i32
    %c0_i32_0 = arith.constant 0 : i32
    %c0_i32_1 = arith.constant 0 : i32
    return %c0_i32, %c0_i32_0 : i32, i32
  }
  func.func @transform_3(%arg0: i32) -> (i32, i32) {
    %c0_i32 = arith.constant 0 : i32
    %c0_i32_0 = arith.constant 0 : i32
    return %arg0, %c0_i32 : i32, i32
  }
}

module attributes {stable_mosaic.version = 11 : i64} {
  func.func @_matmul_bias_relu_kernel(%arg0: i32, %arg1: memref<64x256xbf16, #tpu.memory_space<vmem>>, %arg2: memref<256x128xbf16, #tpu.memory_space<vmem>>, %arg3: memref<1x128xf32, #tpu.memory_space<vmem>>, %arg4: memref<64x128xbf16, #tpu.memory_space<vmem>>) attributes {dimension_semantics = [#tpu.dimension_semantics<parallel>], iteration_bounds = array<i64: 2>, scalar_prefetch = 0 : i64, scratch_operands = 0 : i64, tpu.core_type = #tpu.core_type<tc>, window_params = [{transform_indices = @transform_0, window_bounds = array<i64: 64, 256>}, {pipeline_mode = #tpu.pipeline_mode<synchronous>, transform_indices = @transform_1, window_bounds = array<i64: 256, 128>}, {pipeline_mode = #tpu.pipeline_mode<synchronous>, transform_indices = @transform_2, window_bounds = array<i64: 1, 128>}, {transform_indices = @transform_3, window_bounds = array<i64: 64, 128>}]} {
    %c0 = arith.constant 0 : index
    %c0_0 = arith.constant 0 : index
    %0 = vector.load %arg1[%c0, %c0_0] : memref<64x256xbf16, #tpu.memory_space<vmem>>, vector<64x256xbf16>
    %c0_1 = arith.constant 0 : index
    %c0_2 = arith.constant 0 : index
    %1 = vector.load %arg2[%c0_1, %c0_2] : memref<256x128xbf16, #tpu.memory_space<vmem>>, vector<256x128xbf16>
    %cst = arith.constant dense<0.000000e+00> : vector<64x128xf32>
    %2 = tpu.matmul %0, %1, %cst {dimension_numbers = #tpu.dot_dimension_numbers<[1], [0], [0], [1], [0, 0, 1, 1], [], []>} : vector<64x256xbf16>, vector<256x128xbf16>, vector<64x128xf32> -> vector<64x128xf32>
    %c0_3 = arith.constant 0 : index
    %c0_4 = arith.constant 0 : index
    %3 = vector.load %arg3[%c0_3, %c0_4] : memref<1x128xf32, #tpu.memory_space<vmem>>, vector<1x128xf32>
    %4 = vector.broadcast %3 : vector<1x128xf32> to vector<64x128xf32>
    %5 = arith.addf %2, %4 : vector<64x128xf32>
    %cst_5 = arith.constant 0.000000e+00 : f32
    %6 = vector.broadcast %cst_5 : f32 to vector<64x128xf32>
    %7 = arith.maximumf %5, %6 : vector<64x128xf32>
    %8 = arith.truncf %7 : vector<64x128xf32> to vector<64x128xbf16>
    %c0_6 = arith.constant 0 : index
    %c0_7 = arith.constant 0 : index
    %9 = vector.load %arg4[%c0_6, %c0_7] : memref<64x128xbf16, #tpu.memory_space<vmem>>, vector<64x128xbf16>
    tpu.vector_store %arg4[%c0_6, %c0_7], %8 {strides = array<i32>} : memref<64x128xbf16, #tpu.memory_space<vmem>>, vector<64x128xbf16>,
    return
  }
  func.func @transform_0(%arg0: i32) -> (i32, i32) {
    %c0_i32 = arith.constant 0 : i32
    %c0_i32_0 = arith.constant 0 : i32
    return %arg0, %c0_i32 : i32, i32
  }
  func.func @transform_1(%arg0: i32) -> (i32, i32) {
    %c0_i32 = arith.constant 0 : i32
    %c0_i32_0 = arith.constant 0 : i32
    %c0_i32_1 = arith.constant 0 : i32
    return %c0_i32, %c0_i32_0 : i32, i32
  }
  func.func @transform_2(%arg0: i32) -> (i32, i32) {
    %c0_i32 = arith.constant 0 : i32
    %c0_i32_0 = arith.constant 0 : i32
    %c0_i32_1 = arith.constant 0 : i32
    return %c0_i32, %c0_i32_0 : i32, i32
  }
  func.func @transform_3(%arg0: i32) -> (i32, i32) {
    %c0_i32 = arith.constant 0 : i32
    %c0_i32_0 = arith.constant 0 : i32
    return %arg0, %c0_i32 : i32, i32
  }
}

module attributes {stable_mosaic.version = 11 : i64} {
  func.func @_matmul_bias_relu_kernel(%arg0: i32, %arg1: memref<16x256xbf16, #tpu.memory_space<vmem>>, %arg2: memref<256x128xbf16, #tpu.memory_space<vmem>>, %arg3: memref<1x128xf32, #tpu.memory_space<vmem>>, %arg4: memref<16x128xbf16, #tpu.memory_space<vmem>>) attributes {dimension_semantics = [#tpu.dimension_semantics<parallel>], iteration_bounds = array<i64: 2>, scalar_prefetch = 0 : i64, scratch_operands = 0 : i64, tpu.core_type = #tpu.core_type<tc>, window_params = [{transform_indices = @transform_0, window_bounds = array<i64: 16, 256>}, {pipeline_mode = #tpu.pipeline_mode<synchronous>, transform_indices = @transform_1, window_bounds = array<i64: 256, 128>}, {pipeline_mode = #tpu.pipeline_mode<synchronous>, transform_indices = @transform_2, window_bounds = array<i64: 1, 128>}, {transform_indices = @transform_3, window_bounds = array<i64: 16, 128>}]} {
    %c0 = arith.constant 0 : index
    %c0_0 = arith.constant 0 : index
    %0 = vector.load %arg1[%c0, %c0_0] : memref<16x256xbf16, #tpu.memory_space<vmem>>, vector<16x256xbf16>
    %c0_1 = arith.constant 0 : index
    %c0_2 = arith.constant 0 : index
    %1 = vector.load %arg2[%c0_1, %c0_2] : memref<256x128xbf16, #tpu.memory_space<vmem>>, vector<256x128xbf16>
    %cst = arith.constant dense<0.000000e+00> : vector<16x128xf32>
    %2 = tpu.matmul %0, %1, %cst {dimension_numbers = #tpu.dot_dimension_numbers<[1], [0], [0], [1], [0, 0, 1, 1], [], []>} : vector<16x256xbf16>, vector<256x128xbf16>, vector<16x128xf32> -> vector<16x128xf32>
    %c0_3 = arith.constant 0 : index
    %c0_4 = arith.constant 0 : index
    %3 = vector.load %arg3[%c0_3, %c0_4] : memref<1x128xf32, #tpu.memory_space<vmem>>, vector<1x128xf32>
    %4 = vector.broadcast %3 : vector<1x128xf32> to vector<16x128xf32>
    %5 = arith.addf %2, %4 : vector<16x128xf32>
    %cst_5 = arith.constant 0.000000e+00 : f32
    %6 = vector.broadcast %cst_5 : f32 to vector<16x128xf32>
    %7 = arith.maximumf %5, %6 : vector<16x128xf32>
    %8 = arith.truncf %7 : vector<16x128xf32> to vector<16x128xbf16>
    %c0_6 = arith.constant 0 : index
    %c0_7 = arith.constant 0 : index
    %9 = vector.load %arg4[%c0_6, %c0_7] : memref<16x128xbf16, #tpu.memory_space<vmem>>, vector<16x128xbf16>
    tpu.vector_store %arg4[%c0_6, %c0_7], %8 {strides = array<i32>} : memref<16x128xbf16, #tpu.memory_space<vmem>>, vector<16x128xbf16>,
    return
  }
  func.func @transform_0(%arg0: i32) -> (i32, i32) {
    %c0_i32 = arith.constant 0 : i32
    %c0_i32_0 = arith.constant 0 : i32
    return %arg0, %c0_i32 : i32, i32
  }
  func.func @transform_1(%arg0: i32) -> (i32, i32) {
    %c0_i32 = arith.constant 0 : i32
    %c0_i32_0 = arith.constant 0 : i32
    %c0_i32_1 = arith.constant 0 : i32
    return %c0_i32, %c0_i32_0 : i32, i32
  }
  func.func @transform_2(%arg0: i32) -> (i32, i32) {
    %c0_i32 = arith.constant 0 : i32
    %c0_i32_0 = arith.constant 0 : i32
    %c0_i32_1 = arith.constant 0 : i32
    return %c0_i32, %c0_i32_0 : i32, i32
  }
  func.func @transform_3(%arg0: i32) -> (i32, i32) {
    %c0_i32 = arith.constant 0 : i32
    %c0_i32_0 = arith.constant 0 : i32
    return %arg0, %c0_i32 : i32, i32
  }
}

module attributes {stable_mosaic.version = 11 : i64} {
  func.func @_matmul_bias_relu_kernel(%arg0: i32, %arg1: memref<16x384xbf16, #tpu.memory_space<vmem>>, %arg2: memref<384x128xbf16, #tpu.memory_space<vmem>>, %arg3: memref<1x128xf32, #tpu.memory_space<vmem>>, %arg4: memref<16x128xbf16, #tpu.memory_space<vmem>>) attributes {dimension_semantics = [#tpu.dimension_semantics<parallel>], iteration_bounds = array<i64: 2>, scalar_prefetch = 0 : i64, scratch_operands = 0 : i64, tpu.core_type = #tpu.core_type<tc>, window_params = [{transform_indices = @transform_0, window_bounds = array<i64: 16, 384>}, {pipeline_mode = #tpu.pipeline_mode<synchronous>, transform_indices = @transform_1, window_bounds = array<i64: 384, 128>}, {pipeline_mode = #tpu.pipeline_mode<synchronous>, transform_indices = @transform_2, window_bounds = array<i64: 1, 128>}, {transform_indices = @transform_3, window_bounds = array<i64: 16, 128>}]} {
    %c0 = arith.constant 0 : index
    %c0_0 = arith.constant 0 : index
    %0 = vector.load %arg1[%c0, %c0_0] : memref<16x384xbf16, #tpu.memory_space<vmem>>, vector<16x384xbf16>
    %c0_1 = arith.constant 0 : index
    %c0_2 = arith.constant 0 : index
    %1 = vector.load %arg2[%c0_1, %c0_2] : memref<384x128xbf16, #tpu.memory_space<vmem>>, vector<384x128xbf16>
    %cst = arith.constant dense<0.000000e+00> : vector<16x128xf32>
    %2 = tpu.matmul %0, %1, %cst {dimension_numbers = #tpu.dot_dimension_numbers<[1], [0], [0], [1], [0, 0, 1, 1], [], []>} : vector<16x384xbf16>, vector<384x128xbf16>, vector<16x128xf32> -> vector<16x128xf32>
    %c0_3 = arith.constant 0 : index
    %c0_4 = arith.constant 0 : index
    %3 = vector.load %arg3[%c0_3, %c0_4] : memref<1x128xf32, #tpu.memory_space<vmem>>, vector<1x128xf32>
    %4 = vector.broadcast %3 : vector<1x128xf32> to vector<16x128xf32>
    %5 = arith.addf %2, %4 : vector<16x128xf32>
    %cst_5 = arith.constant 0.000000e+00 : f32
    %6 = vector.broadcast %cst_5 : f32 to vector<16x128xf32>
    %7 = arith.maximumf %5, %6 : vector<16x128xf32>
    %8 = arith.truncf %7 : vector<16x128xf32> to vector<16x128xbf16>
    %c0_6 = arith.constant 0 : index
    %c0_7 = arith.constant 0 : index
    %9 = vector.load %arg4[%c0_6, %c0_7] : memref<16x128xbf16, #tpu.memory_space<vmem>>, vector<16x128xbf16>
    tpu.vector_store %arg4[%c0_6, %c0_7], %8 {strides = array<i32>} : memref<16x128xbf16, #tpu.memory_space<vmem>>, vector<16x128xbf16>,
    return
  }
  func.func @transform_0(%arg0: i32) -> (i32, i32) {
    %c0_i32 = arith.constant 0 : i32
    %c0_i32_0 = arith.constant 0 : i32
    return %arg0, %c0_i32 : i32, i32
  }
  func.func @transform_1(%arg0: i32) -> (i32, i32) {
    %c0_i32 = arith.constant 0 : i32
    %c0_i32_0 = arith.constant 0 : i32
    %c0_i32_1 = arith.constant 0 : i32
    return %c0_i32, %c0_i32_0 : i32, i32
  }
  func.func @transform_2(%arg0: i32) -> (i32, i32) {
    %c0_i32 = arith.constant 0 : i32
    %c0_i32_0 = arith.constant 0 : i32
    %c0_i32_1 = arith.constant 0 : i32
    return %c0_i32, %c0_i32_0 : i32, i32
  }
  func.func @transform_3(%arg0: i32) -> (i32, i32) {
    %c0_i32 = arith.constant 0 : i32
    %c0_i32_0 = arith.constant 0 : i32
    return %arg0, %c0_i32 : i32, i32
  }
}

</mosaic_0001>

<bundles_post_ra>
// kernel: _lambda_.13
= control target key start
LH: loop header
LB: loop body
LE: loop exit
PB: predicated region body
PF: predicated region fallthrough
CT: control target
= control target key end

     0   :  { %s1877_s17 = smov 0   ;;  %s2129_s0 = inlined_call_operand.vmem [shape: bf16[128,128], index: 0, kind: input, shape index: {}]   ;;  %s2130_s1 = inlined_call_operand.vmem [shape: f32[1,128], index: 1, kind: input, shape index: {}]   ;;  %s2131_s2 = inlined_call_operand.vmem [shape: bf16[512,36], index: 2, kind: input, shape index: {}]   ;;  %s2132_s3 = inlined_call_operand.<no memory space> [shape: bf16[], index: 3, kind: input, shape index: {}]   ;;  %s2133_s4 = inlined_call_operand.vmem [shape: bf16[512,128], index: 4, kind: output, shape index: {}]  }
   0x1   :  { %v9_v0 = vstv %s2132_s3 }
   0x2   :  { %v1875_v1 = vunpack.i.l.bf16 %v9_v0 }
   0x3 LB: > { %s1491_s18 = sadd.s32 4294967295, %s1844_s17   ;;  %p1495_p0 = scmp.ge.s32.totalorder %s1844_s17, 1  ;;  %s1844_s17 = sphi %s1877_s17, %s19_s17  }
   0x4   : > { %p144_p1 = scmp.lt.s32.totalorder %s1844_s17, 3 }
   0x6   : > { %p145_p2 = pnand %p1495_p0, %p144_p1 }
   0x8   : > { %148 = sbr.rel (%p145_p2) target bundleno = 294 (0x126), region = 32 }
   0xf   : > { %v1814_v2 = vld [vmem:[%s2129_s0] sm:$0xff]   ;;  %s1496_s3 = sshll.u32 %s1491_s18, 5  ;;  %v192_v3 = vlaneseq  ;;  %v1815_v4 = vld [vmem:[%s2129_s0 + $0x8] sm:$0xff]   ;;  %v1816_v5 = vld [vmem:[%s2129_s0 + $0x10] sm:$0xff]   ;;  %v1846_v26 = vmov 0.0  }
  0x10   : > { %p169_p3 = scmp.lt.s32.totalorder %s1496_s3, 63  ;;  %1741 = vmatprep.subr.bf16.mxu0 %v1814_v2  ;;  %1789 = vmatprep.subr.bf16.mxu1 %v1814_v2  ;;  %v1817_v7 = vld [vmem:[%s2129_s0 + $0x18] sm:$0xff]   ;;  %v1818_v25 = vld [vmem:[%s2129_s0 + $0x20] sm:$0xff]   ;;  %v1819_v47 = vld [vmem:[%s2129_s0 + $0x28] sm:$0xff]  }
  0x11   : > { %1742 = vmatpush3.bf16.msra.mxu0 %v1814_v2  ;;  %1797 = vmatpush3.bf16.msra.mxu1 %v1814_v2  ;;  %v1896_v6 = vand.u32 127, %v192_v3  ;;  %v1820_v61 = vld [vmem:[%s2129_s0 + $0x30] sm:$0xff]  }
  0x12   : > { %s2135_s3 = smov (!%p169_p3, %s1496_s3), 63  ;;  %1743 = vmatprep.subr.bf16.mxu0 %v1815_v4  ;;  %1790 = vmatprep.subr.bf16.mxu1 %v1815_v4 }
  0x13   : > { %s1497_s25 = sshll.u32 %s2135_s3, 2  ;;  %vm195_vm0 = vcmp.lt.s32.totalorder %v1896_v6, 36 }
  0x14   : > { %s1904_s28 = scalar_lea.vmem %s2131_s2, %s1497_s25  ;;  %s2084_s18 = scalar_lea.vmem %s2133_s4, %s1497_s25 }
  0x15   : > { %1744 = vmatpush3.bf16.msra.mxu0 %v1815_v4  ;;  %1798 = vmatpush3.bf16.msra.mxu1 %v1815_v4  ;;  %v189_v8 = vld [vmem:[%s1904_s28] sm:$0xff]   ;;  %v1501_v10 = vld [vmem:[%s1904_s28 + $0x8] sm:$0xff]   ;;  %v1503_v16 = vld [vmem:[%s1904_s28 + $0x10] sm:$0xff]  }
  0x16   : > { %1745 = vmatprep.subr.bf16.mxu0 %v1816_v5  ;;  %1791 = vmatprep.subr.bf16.mxu1 %v1816_v5  ;;  %v1515_v9 = vld [vmem:[%s1904_s28 + $0x40] sm:$0xff]   ;;  %v190_v11 = vunpack.c.l.bf16 %v189_v8  ;;  %v211_v12 = vunpack.c.h.bf16 %v189_v8  ;;  %v1517_v15 = vld [vmem:[%s1904_s28 + $0x48] sm:$0xff]   ;;  %v233_v17 = vunpack.c.l.bf16 %v1501_v10  ;;  %v255_v18 = vunpack.c.h.bf16 %v1501_v10  ;;  %v1519_v31 = vld [vmem:[%s1904_s28 + $0x50] sm:$0xff]  }
  0x17   : > { %v541_v13 = vunpack.c.l.bf16 %v1515_v9  ;;  %v563_v14 = vunpack.c.h.bf16 %v1515_v9  ;;  %v585_v19 = vunpack.c.l.bf16 %v1517_v15  ;;  %v607_v20 = vunpack.c.h.bf16 %v1517_v15  ;;  %v1505_v40 = vld [vmem:[%s1904_s28 + $0x18] sm:$0xff]   ;;  %v1507_v46 = vld [vmem:[%s1904_s28 + $0x20] sm:$0xff]   ;;  %v1509_v8 = vld [vmem:[%s1904_s28 + $0x28] sm:$0xff]  }
  0x18   : > { %v196_v21 = vsel %vm195_vm0, %v190_v11, %v1875_v1  ;;  %v217_v22 = vsel %vm195_vm0, %v211_v12, %v1875_v1  ;;  %v277_v24 = vunpack.c.l.bf16 %v1503_v16  ;;  %v299_v30 = vunpack.c.h.bf16 %v1503_v16  ;;  %v1521_v41 = vld [vmem:[%s1904_s28 + $0x58] sm:$0xff]   ;;  %v1523_v56 = vld [vmem:[%s1904_s28 + $0x60] sm:$0xff]   ;;  %v1525_v9 = vld [vmem:[%s1904_s28 + $0x68] sm:$0xff]  }
  0x19   : > { %1746 = vmatpush3.bf16.msra.mxu0 %v1816_v5  ;;  %1799 = vmatpush3.bf16.msra.mxu1 %v1816_v5  ;;  %v547_v23 = vsel %vm195_vm0, %v541_v13, %v1875_v1  ;;  %v197_v27 = vpack.c.bf16 %v1846_v26, %v196_v21  ;;  %v219_v28 = vpack.c.bf16 %v1846_v26, %v217_v22  ;;  %v629_v45 = vunpack.c.l.bf16 %v1519_v31  ;;  %v1511_v10 = vld [vmem:[%s1904_s28 + $0x30] sm:$0xff]  }
  0x1a   : > { %1747 = vmatprep.subr.bf16.mxu0 %v1817_v7  ;;  %1792 = vmatprep.subr.bf16.mxu1 %v1817_v7  ;;  %v549_v29 = vpack.c.bf16 %v1846_v26, %v547_v23  ;;  %v569_v32 = vsel %vm195_vm0, %v563_v14, %v1875_v1  ;;  %v239_v33 = vsel %vm195_vm0, %v233_v17, %v1875_v1  ;;  %v651_v51 = vunpack.c.h.bf16 %v1519_v31 }
  0x1b   : > { %v261_v34 = vsel %vm195_vm0, %v255_v18, %v1875_v1  ;;  %v591_v35 = vsel %vm195_vm0, %v585_v19, %v1875_v1  ;;  %199 = vst [vmem:[#allocation7] sm:$0xf] %v197_v27  ;;  %221 = vst [vmem:[#allocation7 + $0x4] sm:$0xf] %v219_v28  ;;  %v571_v36 = vpack.c.bf16 %v1846_v26, %v569_v32  ;;  %v321_v53 = vunpack.c.l.bf16 %v1505_v40  ;;  %v1821_v27 = vld [vmem:[%s2129_s0 + $0x38] sm:$0xff]  }
  0x1c   : > { %551 = vst [vmem:[#allocation7 + $0x40] sm:$0xf] %v549_v29  ;;  %v241_v37 = vpack.c.bf16 %v1846_v26, %v239_v33  ;;  %v263_v38 = vpack.c.bf16 %v1846_v26, %v261_v34  ;;  %v593_v39 = vpack.c.bf16 %v1846_v26, %v591_v35  ;;  %v613_v42 = vsel %vm195_vm0, %v607_v20, %v1875_v1  ;;  %v1527_v20 = vld [vmem:[%s1904_s28 + $0x70] sm:$0xff]  }
  0x1d   : > { %1748 = vmatpush3.bf16.msra.mxu0 %v1817_v7  ;;  %1800 = vmatpush3.bf16.msra.mxu1 %v1817_v7  ;;  %v283_v43 = vsel %vm195_vm0, %v277_v24, %v1875_v1  ;;  %v305_v44 = vsel %vm195_vm0, %v299_v30, %v1875_v1  ;;  %573 = vst [vmem:[#allocation7 + $0x44] sm:$0xf] %v571_v36  ;;  %v343_v54 = vunpack.c.h.bf16 %v1505_v40  ;;  %v673_v55 = vunpack.c.l.bf16 %v1521_v41  ;;  %v1513_v36 = vld [vmem:[%s1904_s28 + $0x38] sm:$0xff]  }
  0x1e   : > { %1749 = vmatprep.subr.bf16.mxu0 %v1818_v25  ;;  %1793 = vmatprep.subr.bf16.mxu1 %v1818_v25  ;;  %243 = vst [vmem:[#allocation7 + $0x8] sm:$0xf] %v241_v37  ;;  %265 = vst [vmem:[#allocation7 + $0xc] sm:$0xf] %v263_v38  ;;  %v615_v48 = vpack.c.bf16 %v1846_v26, %v613_v42  ;;  %v285_v49 = vpack.c.bf16 %v1846_v26, %v283_v43  ;;  %v695_v59 = vunpack.c.h.bf16 %v1521_v41 }
  0x1f   : > { %595 = vst [vmem:[#allocation7 + $0x48] sm:$0xf] %v593_v39  ;;  %v307_v50 = vpack.c.bf16 %v1846_v26, %v305_v44  ;;  %v635_v52 = vsel %vm195_vm0, %v629_v45, %v1875_v1  ;;  %v657_v58 = vsel %vm195_vm0, %v651_v51, %v1875_v1  ;;  %v365_v60 = vunpack.c.l.bf16 %v1507_v46  ;;  %v1529_v45 = vld [vmem:[%s1904_s28 + $0x78] sm:$0xff]  }
  0x20   : > { %617 = vst [vmem:[#allocation7 + $0x4c] sm:$0xf] %v615_v48  ;;  %287 = vst [vmem:[#allocation7 + $0x10] sm:$0xf] %v285_v49  ;;  %v637_v57 = vpack.c.bf16 %v1846_v26, %v635_v52  ;;  %v659_v62 = vpack.c.bf16 %v1846_v26, %v657_v58  ;;  %v327_v63 = vsel %vm195_vm0, %v321_v53, %v1875_v1  ;;  %v387_v2 = vunpack.c.h.bf16 %v1507_v46 }
  0x21   : > { %309 = vst [vmem:[#allocation7 + $0x14] sm:$0xf] %v307_v50  ;;  %1750 = vmatpush3.bf16.msra.mxu0 %v1818_v25  ;;  %1801 = vmatpush3.bf16.msra.mxu1 %v1818_v25  ;;  %v349_v0 = vsel %vm195_vm0, %v343_v54, %v1875_v1  ;;  %v329_v3 = vpack.c.bf16 %v1846_v26, %v327_v63  ;;  %v717_v7 = vunpack.c.l.bf16 %v1523_v56  ;;  %v739_v23 = vunpack.c.h.bf16 %v1523_v56 }
  0x22   : > { %1751 = vmatprep.subr.bf16.mxu0 %v1819_v47  ;;  %1794 = vmatprep.subr.bf16.mxu1 %v1819_v47  ;;  %639 = vst [vmem:[#allocation7 + $0x50] sm:$0xf] %v637_v57  ;;  %v351_v4 = vpack.c.bf16 %v1846_v26, %v349_v0  ;;  %v679_v5 = vsel %vm195_vm0, %v673_v55, %v1875_v1  ;;  %v1822_v11 = vld [vmem:[#allocation7] sm:$0xff]   ;;  %661 = vst [vmem:[#allocation7 + $0x54] sm:$0xf] %v659_v62  ;;  %v409_v24 = vunpack.c.l.bf16 %v1509_v8 }
  0x23   : > { %v681_v12 = vpack.c.bf16 %v1846_v26, %v679_v5  ;;  %v701_v13 = vsel %vm195_vm0, %v695_v59, %v1875_v1  ;;  %v371_v14 = vsel %vm195_vm0, %v365_v60, %v1875_v1  ;;  %v393_v15 = vsel %vm195_vm0, %v387_v2, %v1875_v1  ;;  %331 = vst [vmem:[#allocation7 + $0x18] sm:$0xf] %v329_v3 }
  0x24   : > { %353 = vst [vmem:[#allocation7 + $0x1c] sm:$0xf] %v351_v4  ;;  %v703_v16 = vpack.c.bf16 %v1846_v26, %v701_v13  ;;  %v373_v17 = vpack.c.bf16 %v1846_v26, %v371_v14  ;;  %v395_v18 = vpack.c.bf16 %v1846_v26, %v393_v15  ;;  %v723_v19 = vsel %vm195_vm0, %v717_v7, %v1875_v1  ;;  %v1823_v21 = vld [vmem:[#allocation7 + $0x40] sm:$0xff]  }
  0x25   : > { %1752 = vmatpush3.bf16.msra.mxu0 %v1819_v47  ;;  %1802 = vmatpush3.bf16.msra.mxu1 %v1819_v47  ;;  %683 = vst [vmem:[#allocation7 + $0x58] sm:$0xf] %v681_v12  ;;  %v725_v22 = vpack.c.bf16 %v1846_v26, %v723_v19  ;;  %v431_v25 = vunpack.c.h.bf16 %v1509_v8  ;;  %v761_v28 = vunpack.c.l.bf16 %v1525_v9  ;;  %v783_v29 = vunpack.c.h.bf16 %v1525_v9  ;;  %v1824_v50 = vld [vmem:[#allocation7 + $0x8] sm:$0xff]  }
  0x26   : > { %1753 = vmatprep.subr.bf16.mxu0 %v1820_v61  ;;  %1795 = vmatprep.subr.bf16.mxu1 %v1820_v61  ;;  %705 = vst [vmem:[#allocation7 + $0x5c] sm:$0xf] %v703_v16  ;;  %375 = vst [vmem:[#allocation7 + $0x20] sm:$0xf] %v373_v17  ;;  %v453_v30 = vunpack.c.l.bf16 %v1511_v10  ;;  %v475_v31 = vunpack.c.h.bf16 %v1511_v10  ;;  %v745_v32 = vsel %vm195_vm0, %v739_v23, %v1875_v1  ;;  %v805_v35 = vunpack.c.l.bf16 %v1527_v20  ;;  %v2069_v16 = vld [vmem:[%s2130_s1] ss:$0 sm:$0xff] }
  0x27   : > { %397 = vst [vmem:[#allocation7 + $0x24] sm:$0xf] %v395_v18  ;;  %1757 = vmatprep.mubr.bf16.mxu0 %v1822_v11  ;;  %1773 = vmatprep.mubr.bf16.mxu1 %v1823_v21  ;;  %727 = vst [vmem:[#allocation7 + $0x60] sm:$0xf] %v725_v22  ;;  %v415_v33 = vsel %vm195_vm0, %v409_v24, %v1875_v1  ;;  %v437_v34 = vsel %vm195_vm0, %v431_v25, %v1875_v1  ;;  %v827_v44 = vunpack.c.h.bf16 %v1527_v20  ;;  %v1825_v55 = vld [vmem:[#allocation7 + $0x48] sm:$0xff]  }
  0x28   : > { %v747_v37 = vpack.c.bf16 %v1846_v26, %v745_v32  ;;  %v417_v38 = vpack.c.bf16 %v1846_v26, %v415_v33  ;;  %v439_v39 = vpack.c.bf16 %v1846_v26, %v437_v34  ;;  %v767_v40 = vsel %vm195_vm0, %v761_v28, %v1875_v1  ;;  %v1826_v56 = vld [vmem:[#allocation7 + $0x10] sm:$0xff]  }
  0x29   : > { %1754 = vmatpush3.bf16.msra.mxu0 %v1820_v61  ;;  %1803 = vmatpush3.bf16.msra.mxu1 %v1820_v61  ;;  %v769_v41 = vpack.c.bf16 %v1846_v26, %v767_v40  ;;  %v789_v42 = vsel %vm195_vm0, %v783_v29, %v1875_v1  ;;  %v459_v43 = vsel %vm195_vm0, %v453_v30, %v1875_v1  ;;  %v497_v49 = vunpack.c.l.bf16 %v1513_v36  ;;  %v1827_v61 = vld [vmem:[#allocation7 + $0x50] sm:$0xff]  }
  0x2a   : > { %1755 = vmatprep.subr.bf16.mxu0 %v1821_v27  ;;  %1796 = vmatprep.subr.bf16.mxu1 %v1821_v27  ;;  %749 = vst [vmem:[#allocation7 + $0x64] sm:$0xf] %v747_v37  ;;  %419 = vst [vmem:[#allocation7 + $0x28] sm:$0xf] %v417_v38  ;;  %v791_v46 = vpack.c.bf16 %v1846_v26, %v789_v42  ;;  %v461_v47 = vpack.c.bf16 %v1846_v26, %v459_v43  ;;  %v519_v54 = vunpack.c.h.bf16 %v1513_v36 }
  0x2b   : > { %441 = vst [vmem:[#allocation7 + $0x2c] sm:$0xf] %v439_v39  ;;  %v481_v48 = vsel %vm195_vm0, %v475_v31, %v1875_v1  ;;  %771 = vst [vmem:[#allocation7 + $0x68] sm:$0xf] %v769_v41  ;;  %v811_v52 = vsel %vm195_vm0, %v805_v35, %v1875_v1  ;;  %v833_v53 = vsel %vm195_vm0, %v827_v44, %v1875_v1  ;;  %v849_v60 = vunpack.c.l.bf16 %v1529_v45  ;;  %v1828_v8 = vld [vmem:[#allocation7 + $0x18] sm:$0xff]  }
  0x2c   : > { %v483_v51 = vpack.c.bf16 %v1846_v26, %v481_v48  ;;  %793 = vst [vmem:[#allocation7 + $0x6c] sm:$0xf] %v791_v46  ;;  %463 = vst [vmem:[#allocation7 + $0x30] sm:$0xf] %v461_v47  ;;  %v813_v57 = vpack.c.bf16 %v1846_v26, %v811_v52  ;;  %v835_v58 = vpack.c.bf16 %v1846_v26, %v833_v53  ;;  %v871_v0 = vunpack.c.h.bf16 %v1529_v45 }
  0x2d   : > { %v503_v59 = vsel %vm195_vm0, %v497_v49, %v1875_v1  ;;  %1756 = vmatpush3.bf16.msra.mxu0 %v1821_v27  ;;  %1804 = vmatpush3.bf16.msra.mxu1 %v1821_v27  ;;  %v525_v63 = vsel %vm195_vm0, %v519_v54, %v1875_v1  ;;  %v855_v3 = vsel %vm195_vm0, %v849_v60, %v1875_v1  ;;  %v1829_v9 = vld [vmem:[#allocation7 + $0x58] sm:$0xff]  }
  0x2e   : > { %485 = vst [vmem:[#allocation7 + $0x34] sm:$0xf] %v483_v51  ;;  %v505_v62 = vpack.c.bf16 %v1846_v26, %v503_v59  ;;  %815 = vst [vmem:[#allocation7 + $0x70] sm:$0xf] %v813_v57  ;;  %v527_v2 = vpack.c.bf16 %v1846_v26, %v525_v63  ;;  %v857_v4 = vpack.c.bf16 %v1846_v26, %v855_v3  ;;  %v1830_v10 = vld [vmem:[#allocation7 + $0x20] sm:$0xff]  }
  0x2f   : > { %837 = vst [vmem:[#allocation7 + $0x74] sm:$0xf] %v835_v58  ;;  %v877_v5 = vsel %vm195_vm0, %v871_v0, %v1875_v1 }
  0x30   : > { %507 = vst [vmem:[#allocation7 + $0x38] sm:$0xf] %v505_v62  ;;  %1758 = vmatmul.mubr.bf16.vlgmr.msra.gmra.mrb[0].mxu0 %v1824_v50  ;;  %1774 = vmatmul.mubr.bf16.vlgmr.msra.gmra.mrb[0].mxu1 %v1825_v55  ;;  %529 = vst [vmem:[#allocation7 + $0x3c] sm:$0xf] %v527_v2  ;;  %v879_v7 = vpack.c.bf16 %v1846_v26, %v877_v5 }
  0x31   : > { %1761 = vmatprep.mubr.bf16.mxu0 %v1826_v56  ;;  %1777 = vmatprep.mubr.bf16.mxu1 %v1827_v61  ;;  %859 = vst [vmem:[#allocation7 + $0x78] sm:$0xf] %v857_v4  ;;  %v1831_v11 = vld [vmem:[#allocation7 + $0x60] sm:$0xff]  }
  0x32   : > { %881 = vst [vmem:[#allocation7 + $0x7c] sm:$0xf] %v879_v7  ;;  %v1832_v12 = vld [vmem:[#allocation7 + $0x28] sm:$0xff]  }
  0x33   : > { %v1833_v6 = vld [vmem:[#allocation7 + $0x68] sm:$0xff]  }
  0x35   : > { %v1834_v13 = vld [vmem:[#allocation7 + $0x30] sm:$0xff]  }
  0x36   : > { %v1835_v14 = vld [vmem:[#allocation7 + $0x70] sm:$0xff]  }
  0x37   : > { %v1836_v26 = vld [vmem:[#allocation7 + $0x38] sm:$0xff]  }
  0x38   : > { %1762 = vmatmul.mubr.bf16.gmra.mrb[4].mxu0 %v1828_v8  ;;  %1778 = vmatmul.mubr.bf16.gmra.mrb[4].mxu1 %v1829_v9 }
  0x39   : > { %1765 = vmatprep.mubr.bf16.mxu0 %v1830_v10  ;;  %1781 = vmatprep.mubr.bf16.mxu1 %v1831_v11  ;;  %v1837_v15 = vld [vmem:[#allocation7 + $0x78] sm:$0xff]  }
  0x40   : > { %1766 = vmatmul.mubr.bf16.gmra.mrb[8].mxu0 %v1832_v12  ;;  %1782 = vmatmul.mubr.bf16.gmra.mrb[8].mxu1 %v1833_v6 }
  0x41   : > { %1769 = vmatprep.mubr.bf16.mxu0 %v1834_v13  ;;  %1785 = vmatprep.mubr.bf16.mxu1 %v1835_v14 }
  0x48   : > { %1770 = vmatmul.mubr.bf16.gmra.mrb[12].mxu0 %v1836_v26  ;;  %1786 = vmatmul.mubr.bf16.gmra.mrb[12].mxu1 %v1837_v15 }
 0x103   : > { %v1759_v17 = vpop.f32.mrb[0].mxu0  ;;  %v1775_v18 = vpop.f32.mrb[0].mxu1 }
 0x104   : > { %v1125_v19 = vadd.f32 %v1759_v17, %v2069_v16  ;;  %v1189_v20 = vadd.f32 %v1775_v18, %v2069_v16  ;;  %v1116_v21 = vpop.f32.mrb[1].mxu0  ;;  %v1180_v22 = vpop.f32.mrb[1].mxu1 }
 0x105   : > { %v1117_v23 = vadd.f32 %v2069_v16, %v1116_v21  ;;  %v1181_v24 = vadd.f32 %v2069_v16, %v1180_v22  ;;  %v1760_v25 = vpop.f32.mrb[2].mxu0  ;;  %v1776_v27 = vpop.f32.mrb[2].mxu1 }
 0x106   : > { %v1128_v28 = vadd.f32 %v1760_v25, %v2069_v16  ;;  %v1192_v29 = vadd.f32 %v1776_v27, %v2069_v16  ;;  %v1119_v30 = vpop.f32.mrb[3].mxu0  ;;  %v1183_v31 = vpop.f32.mrb[3].mxu1  ;;  %v1245_v34 = vmax.f32 %v1125_v19, 0.0  ;;  %v1261_v35 = vmax.f32 %v1189_v20, 0.0 }
 0x107   : > { %v1120_v32 = vadd.f32 %v2069_v16, %v1119_v30  ;;  %v1184_v33 = vadd.f32 %v2069_v16, %v1183_v31  ;;  %v1243_v38 = vmax.f32 %v1117_v23, 0.0  ;;  %v1259_v39 = vmax.f32 %v1181_v24, 0.0 }
 0x108   : > { %v1246_v36 = vmax.f32 %v1128_v28, 0.0  ;;  %v1262_v37 = vmax.f32 %v1192_v29, 0.0 }
 0x109   : > { %v1244_v40 = vmax.f32 %v1120_v32, 0.0  ;;  %v1260_v41 = vmax.f32 %v1184_v33, 0.0 }
 0x10a   : > { %v1630_v42 = vpack.c.bf16 %v1246_v36, %v1245_v34  ;;  %v1670_v43 = vpack.c.bf16 %v1262_v37, %v1261_v35 }
 0x10b   : > { %v1625_v44 = vpack.c.bf16 %v1244_v40, %v1243_v38  ;;  %v1665_v45 = vpack.c.bf16 %v1260_v41, %v1259_v39  ;;  %v1763_v46 = vpop.f32.mrb[4].mxu0  ;;  %v1779_v47 = vpop.f32.mrb[4].mxu1 }
 0x10c   : > { %1702 = vst [vmem:[%s2084_s18 + $0x8] sm:$0xff] %v1630_v42   ;;  %1710 = vst [vmem:[%s2084_s18 + $0x48] sm:$0xff] %v1670_v43   ;;  %v1141_v48 = vadd.f32 %v1763_v46, %v2069_v16  ;;  %v1205_v49 = vadd.f32 %v1779_v47, %v2069_v16  ;;  %v1132_v50 = vpop.f32.mrb[5].mxu0  ;;  %v1196_v51 = vpop.f32.mrb[5].mxu1 }
 0x10d   : > { %1626 = vst [vmem:[%s2084_s18] sm:$0xff] %v1625_v44   ;;  %1709 = vst [vmem:[%s2084_s18 + $0x40] sm:$0xff] %v1665_v45   ;;  %v1133_v52 = vadd.f32 %v2069_v16, %v1132_v50  ;;  %v1197_v53 = vadd.f32 %v2069_v16, %v1196_v51  ;;  %v1764_v54 = vpop.f32.mrb[6].mxu0  ;;  %v1780_v55 = vpop.f32.mrb[6].mxu1 }
 0x10e   : > { %v1144_v56 = vadd.f32 %v1764_v54, %v2069_v16  ;;  %v1208_v57 = vadd.f32 %v1780_v55, %v2069_v16  ;;  %v1135_v58 = vpop.f32.mrb[7].mxu0  ;;  %v1199_v59 = vpop.f32.mrb[7].mxu1  ;;  %v1249_v62 = vmax.f32 %v1141_v48, 0.0  ;;  %v1265_v63 = vmax.f32 %v1205_v49, 0.0 }
 0x10f   : > { %v1136_v60 = vadd.f32 %v2069_v16, %v1135_v58  ;;  %v1200_v61 = vadd.f32 %v2069_v16, %v1199_v59  ;;  %v1247_v3 = vmax.f32 %v1133_v52, 0.0  ;;  %v1263_v4 = vmax.f32 %v1197_v53, 0.0 }
 0x110   : > { %v1250_v0 = vmax.f32 %v1144_v56, 0.0  ;;  %v1266_v2 = vmax.f32 %v1208_v57, 0.0 }
 0x111   : > { %v1248_v5 = vmax.f32 %v1136_v60, 0.0  ;;  %v1264_v7 = vmax.f32 %v1200_v61, 0.0 }
 0x112   : > { %v1640_v8 = vpack.c.bf16 %v1250_v0, %v1249_v62  ;;  %v1680_v9 = vpack.c.bf16 %v1266_v2, %v1265_v63 }
 0x113   : > { %v1635_v10 = vpack.c.bf16 %v1248_v5, %v1247_v3  ;;  %v1675_v11 = vpack.c.bf16 %v1264_v7, %v1263_v4  ;;  %v1767_v12 = vpop.f32.mrb[8].mxu0  ;;  %v1783_v6 = vpop.f32.mrb[8].mxu1 }
 0x114   : > { %1704 = vst [vmem:[%s2084_s18 + $0x18] sm:$0xff] %v1640_v8   ;;  %1712 = vst [vmem:[%s2084_s18 + $0x58] sm:$0xff] %v1680_v9   ;;  %v1157_v13 = vadd.f32 %v1767_v12, %v2069_v16  ;;  %v1221_v14 = vadd.f32 %v1783_v6, %v2069_v16  ;;  %v1148_v26 = vpop.f32.mrb[9].mxu0  ;;  %v1212_v15 = vpop.f32.mrb[9].mxu1 }
 0x115   : > { %1703 = vst [vmem:[%s2084_s18 + $0x10] sm:$0xff] %v1635_v10   ;;  %1711 = vst [vmem:[%s2084_s18 + $0x50] sm:$0xff] %v1675_v11   ;;  %v1149_v17 = vadd.f32 %v2069_v16, %v1148_v26  ;;  %v1213_v18 = vadd.f32 %v2069_v16, %v1212_v15  ;;  %v1768_v19 = vpop.f32.mrb[10].mxu0  ;;  %v1784_v20 = vpop.f32.mrb[10].mxu1 }
 0x116   : > { %v1160_v21 = vadd.f32 %v1768_v19, %v2069_v16  ;;  %v1224_v22 = vadd.f32 %v1784_v20, %v2069_v16  ;;  %v1151_v23 = vpop.f32.mrb[11].mxu0  ;;  %v1215_v24 = vpop.f32.mrb[11].mxu1  ;;  %v1253_v28 = vmax.f32 %v1157_v13, 0.0  ;;  %v1269_v29 = vmax.f32 %v1221_v14, 0.0 }
 0x117   : > { %v1152_v25 = vadd.f32 %v2069_v16, %v1151_v23  ;;  %v1216_v27 = vadd.f32 %v2069_v16, %v1215_v24  ;;  %v1251_v32 = vmax.f32 %v1149_v17, 0.0  ;;  %v1267_v33 = vmax.f32 %v1213_v18, 0.0 }
 0x118   : > { %v1254_v30 = vmax.f32 %v1160_v21, 0.0  ;;  %v1270_v31 = vmax.f32 %v1224_v22, 0.0 }
 0x119   : > { %v1252_v34 = vmax.f32 %v1152_v25, 0.0  ;;  %v1268_v35 = vmax.f32 %v1216_v27, 0.0 }
 0x11a   : > { %v1650_v36 = vpack.c.bf16 %v1254_v30, %v1253_v28  ;;  %v1690_v37 = vpack.c.bf16 %v1270_v31, %v1269_v29 }
 0x11b   : > { %v1645_v38 = vpack.c.bf16 %v1252_v34, %v1251_v32  ;;  %v1685_v39 = vpack.c.bf16 %v1268_v35, %v1267_v33  ;;  %v1771_v40 = vpop.f32.mrb[12].mxu0  ;;  %v1787_v41 = vpop.f32.mrb[12].mxu1 }
 0x11c   : > { %1706 = vst [vmem:[%s2084_s18 + $0x28] sm:$0xff] %v1650_v36   ;;  %1714 = vst [vmem:[%s2084_s18 + $0x68] sm:$0xff] %v1690_v37   ;;  %v1173_v42 = vadd.f32 %v1771_v40, %v2069_v16  ;;  %v1237_v43 = vadd.f32 %v1787_v41, %v2069_v16  ;;  %v1164_v44 = vpop.f32.mrb[13].mxu0  ;;  %v1228_v45 = vpop.f32.mrb[13].mxu1 }
 0x11d   : > { %1705 = vst [vmem:[%s2084_s18 + $0x20] sm:$0xff] %v1645_v38   ;;  %1713 = vst [vmem:[%s2084_s18 + $0x60] sm:$0xff] %v1685_v39   ;;  %v1165_v46 = vadd.f32 %v2069_v16, %v1164_v44  ;;  %v1229_v47 = vadd.f32 %v2069_v16, %v1228_v45  ;;  %v1772_v48 = vpop.f32.mrb[14].mxu0  ;;  %v1788_v49 = vpop.f32.mrb[14].mxu1 }
 0x11e   : > { %v1176_v50 = vadd.f32 %v1772_v48, %v2069_v16  ;;  %v1240_v51 = vadd.f32 %v1788_v49, %v2069_v16  ;;  %v1167_v52 = vpop.f32.mrb[15].mxu0  ;;  %v1231_v53 = vpop.f32.mrb[15].mxu1  ;;  %v1257_v56 = vmax.f32 %v1173_v42, 0.0  ;;  %v1273_v57 = vmax.f32 %v1237_v43, 0.0 }
 0x11f   : > { %v1168_v54 = vadd.f32 %v2069_v16, %v1167_v52  ;;  %v1232_v55 = vadd.f32 %v2069_v16, %v1231_v53  ;;  %v1255_v60 = vmax.f32 %v1165_v46, 0.0  ;;  %v1271_v61 = vmax.f32 %v1229_v47, 0.0 }
 0x120   : > { %v1258_v58 = vmax.f32 %v1176_v50, 0.0  ;;  %v1274_v59 = vmax.f32 %v1240_v51, 0.0 }
 0x121   : > { %v1256_v62 = vmax.f32 %v1168_v54, 0.0  ;;  %v1272_v63 = vmax.f32 %v1232_v55, 0.0 }
 0x122   : > { %v1660_v0 = vpack.c.bf16 %v1258_v58, %v1257_v56  ;;  %v1700_v2 = vpack.c.bf16 %v1274_v59, %v1273_v57 }
 0x123   : > { %v1655_v3 = vpack.c.bf16 %v1256_v62, %v1255_v60  ;;  %v1695_v4 = vpack.c.bf16 %v1272_v63, %v1271_v61 }
 0x124   : > { %1708 = vst [vmem:[%s2084_s18 + $0x38] sm:$0xff] %v1660_v0   ;;  %1716 = vst [vmem:[%s2084_s18 + $0x78] sm:$0xff] %v1700_v2  }
 0x125   : > { %1707 = vst [vmem:[%s2084_s18 + $0x30] sm:$0xff] %v1655_v3   ;;  %1715 = vst [vmem:[%s2084_s18 + $0x70] sm:$0xff] %v1695_v4  }
 0x126 PF: > { %s19_s17 = sadd.s32 1, %s1844_s17  }
 0x127   : > { %p16_p4 = scmp.ge.s32.totalorder %s19_s17, 4  }
 0x129   :  { %18 = sbr.rel (!%p16_p4) target bundleno = 3 (0x3), region = 124 }

// kernel: _lambda_.12
= control target key start
LH: loop header
LB: loop body
LE: loop exit
PB: predicated region body
PF: predicated region fallthrough
CT: control target
= control target key end

     0   :  { %s1877_s17 = smov 0   ;;  %s2129_s0 = inlined_call_operand.vmem [shape: bf16[128,128], index: 0, kind: input, shape index: {}]   ;;  %s2130_s1 = inlined_call_operand.vmem [shape: f32[1,128], index: 1, kind: input, shape index: {}]   ;;  %s2131_s2 = inlined_call_operand.vmem [shape: bf16[512,72], index: 2, kind: input, shape index: {}]   ;;  %s2132_s3 = inlined_call_operand.<no memory space> [shape: bf16[], index: 3, kind: input, shape index: {}]   ;;  %s2133_s4 = inlined_call_operand.vmem [shape: bf16[512,128], index: 4, kind: output, shape index: {}]  }
   0x1   :  { %v9_v0 = vstv %s2132_s3 }
   0x2   :  { %v1875_v1 = vunpack.i.l.bf16 %v9_v0 }
   0x3 LB: > { %s1491_s18 = sadd.s32 4294967295, %s1844_s17   ;;  %p1495_p0 = scmp.ge.s32.totalorder %s1844_s17, 1  ;;  %s1844_s17 = sphi %s1877_s17, %s19_s17  }
   0x4   : > { %p144_p1 = scmp.lt.s32.totalorder %s1844_s17, 3 }
   0x6   : > { %p145_p2 = pnand %p1495_p0, %p144_p1 }
   0x8   : > { %148 = sbr.rel (%p145_p2) target bundleno = 294 (0x126), region = 32 }
   0xf   : > { %v1814_v2 = vld [vmem:[%s2129_s0] sm:$0xff]   ;;  %s1496_s3 = sshll.u32 %s1491_s18, 5  ;;  %v192_v3 = vlaneseq  ;;  %v1815_v4 = vld [vmem:[%s2129_s0 + $0x8] sm:$0xff]   ;;  %v1816_v5 = vld [vmem:[%s2129_s0 + $0x10] sm:$0xff]   ;;  %v1846_v26 = vmov 0.0  }
  0x10   : > { %p169_p3 = scmp.lt.s32.totalorder %s1496_s3, 63  ;;  %1741 = vmatprep.subr.bf16.mxu0 %v1814_v2  ;;  %1789 = vmatprep.subr.bf16.mxu1 %v1814_v2  ;;  %v1817_v7 = vld [vmem:[%s2129_s0 + $0x18] sm:$0xff]   ;;  %v1818_v25 = vld [vmem:[%s2129_s0 + $0x20] sm:$0xff]   ;;  %v1819_v47 = vld [vmem:[%s2129_s0 + $0x28] sm:$0xff]  }
  0x11   : > { %1742 = vmatpush3.bf16.msra.mxu0 %v1814_v2  ;;  %1797 = vmatpush3.bf16.msra.mxu1 %v1814_v2  ;;  %v1896_v6 = vand.u32 127, %v192_v3  ;;  %v1820_v61 = vld [vmem:[%s2129_s0 + $0x30] sm:$0xff]  }
  0x12   : > { %s2135_s3 = smov (!%p169_p3, %s1496_s3), 63  ;;  %1743 = vmatprep.subr.bf16.mxu0 %v1815_v4  ;;  %1790 = vmatprep.subr.bf16.mxu1 %v1815_v4 }
  0x13   : > { %s1497_s25 = sshll.u32 %s2135_s3, 2  ;;  %vm195_vm0 = vcmp.lt.s32.totalorder %v1896_v6, 72 }
  0x14   : > { %s1904_s28 = scalar_lea.vmem %s2131_s2, %s1497_s25  ;;  %s2084_s18 = scalar_lea.vmem %s2133_s4, %s1497_s25 }
  0x15   : > { %1744 = vmatpush3.bf16.msra.mxu0 %v1815_v4  ;;  %1798 = vmatpush3.bf16.msra.mxu1 %v1815_v4  ;;  %v189_v8 = vld [vmem:[%s1904_s28] sm:$0xff]   ;;  %v1501_v10 = vld [vmem:[%s1904_s28 + $0x8] sm:$0xff]   ;;  %v1503_v16 = vld [vmem:[%s1904_s28 + $0x10] sm:$0xff]  }
  0x16   : > { %1745 = vmatprep.subr.bf16.mxu0 %v1816_v5  ;;  %1791 = vmatprep.subr.bf16.mxu1 %v1816_v5  ;;  %v1515_v9 = vld [vmem:[%s1904_s28 + $0x40] sm:$0xff]   ;;  %v190_v11 = vunpack.c.l.bf16 %v189_v8  ;;  %v211_v12 = vunpack.c.h.bf16 %v189_v8  ;;  %v1517_v15 = vld [vmem:[%s1904_s28 + $0x48] sm:$0xff]   ;;  %v233_v17 = vunpack.c.l.bf16 %v1501_v10  ;;  %v255_v18 = vunpack.c.h.bf16 %v1501_v10  ;;  %v1519_v31 = vld [vmem:[%s1904_s28 + $0x50] sm:$0xff]  }
  0x17   : > { %v541_v13 = vunpack.c.l.bf16 %v1515_v9  ;;  %v563_v14 = vunpack.c.h.bf16 %v1515_v9  ;;  %v585_v19 = vunpack.c.l.bf16 %v1517_v15  ;;  %v607_v20 = vunpack.c.h.bf16 %v1517_v15  ;;  %v1505_v40 = vld [vmem:[%s1904_s28 + $0x18] sm:$0xff]   ;;  %v1507_v46 = vld [vmem:[%s1904_s28 + $0x20] sm:$0xff]   ;;  %v1509_v8 = vld [vmem:[%s1904_s28 + $0x28] sm:$0xff]  }
  0x18   : > { %v196_v21 = vsel %vm195_vm0, %v190_v11, %v1875_v1  ;;  %v217_v22 = vsel %vm195_vm0, %v211_v12, %v1875_v1  ;;  %v277_v24 = vunpack.c.l.bf16 %v1503_v16  ;;  %v299_v30 = vunpack.c.h.bf16 %v1503_v16  ;;  %v1521_v41 = vld [vmem:[%s1904_s28 + $0x58] sm:$0xff]   ;;  %v1523_v56 = vld [vmem:[%s1904_s28 + $0x60] sm:$0xff]   ;;  %v1525_v9 = vld [vmem:[%s1904_s28 + $0x68] sm:$0xff]  }
  0x19   : > { %1746 = vmatpush3.bf16.msra.mxu0 %v1816_v5  ;;  %1799 = vmatpush3.bf16.msra.mxu1 %v1816_v5  ;;  %v547_v23 = vsel %vm195_vm0, %v541_v13, %v1875_v1  ;;  %v197_v27 = vpack.c.bf16 %v1846_v26, %v196_v21  ;;  %v219_v28 = vpack.c.bf16 %v1846_v26, %v217_v22  ;;  %v629_v45 = vunpack.c.l.bf16 %v1519_v31  ;;  %v1511_v10 = vld [vmem:[%s1904_s28 + $0x30] sm:$0xff]  }
  0x1a   : > { %1747 = vmatprep.subr.bf16.mxu0 %v1817_v7  ;;  %1792 = vmatprep.subr.bf16.mxu1 %v1817_v7  ;;  %v549_v29 = vpack.c.bf16 %v1846_v26, %v547_v23  ;;  %v569_v32 = vsel %vm195_vm0, %v563_v14, %v1875_v1  ;;  %v239_v33 = vsel %vm195_vm0, %v233_v17, %v1875_v1  ;;  %v651_v51 = vunpack.c.h.bf16 %v1519_v31 }
  0x1b   : > { %v261_v34 = vsel %vm195_vm0, %v255_v18, %v1875_v1  ;;  %v591_v35 = vsel %vm195_vm0, %v585_v19, %v1875_v1  ;;  %199 = vst [vmem:[#allocation7] sm:$0xf] %v197_v27  ;;  %221 = vst [vmem:[#allocation7 + $0x4] sm:$0xf] %v219_v28  ;;  %v571_v36 = vpack.c.bf16 %v1846_v26, %v569_v32  ;;  %v321_v53 = vunpack.c.l.bf16 %v1505_v40  ;;  %v1821_v27 = vld [vmem:[%s2129_s0 + $0x38] sm:$0xff]  }
  0x1c   : > { %551 = vst [vmem:[#allocation7 + $0x40] sm:$0xf] %v549_v29  ;;  %v241_v37 = vpack.c.bf16 %v1846_v26, %v239_v33  ;;  %v263_v38 = vpack.c.bf16 %v1846_v26, %v261_v34  ;;  %v593_v39 = vpack.c.bf16 %v1846_v26, %v591_v35  ;;  %v613_v42 = vsel %vm195_vm0, %v607_v20, %v1875_v1  ;;  %v1527_v20 = vld [vmem:[%s1904_s28 + $0x70] sm:$0xff]  }
  0x1d   : > { %1748 = vmatpush3.bf16.msra.mxu0 %v1817_v7  ;;  %1800 = vmatpush3.bf16.msra.mxu1 %v1817_v7  ;;  %v283_v43 = vsel %vm195_vm0, %v277_v24, %v1875_v1  ;;  %v305_v44 = vsel %vm195_vm0, %v299_v30, %v1875_v1  ;;  %573 = vst [vmem:[#allocation7 + $0x44] sm:$0xf] %v571_v36  ;;  %v343_v54 = vunpack.c.h.bf16 %v1505_v40  ;;  %v673_v55 = vunpack.c.l.bf16 %v1521_v41  ;;  %v1513_v36 = vld [vmem:[%s1904_s28 + $0x38] sm:$0xff]  }
  0x1e   : > { %1749 = vmatprep.subr.bf16.mxu0 %v1818_v25  ;;  %1793 = vmatprep.subr.bf16.mxu1 %v1818_v25  ;;  %243 = vst [vmem:[#allocation7 + $0x8] sm:$0xf] %v241_v37  ;;  %265 = vst [vmem:[#allocation7 + $0xc] sm:$0xf] %v263_v38  ;;  %v615_v48 = vpack.c.bf16 %v1846_v26, %v613_v42  ;;  %v285_v49 = vpack.c.bf16 %v1846_v26, %v283_v43  ;;  %v695_v59 = vunpack.c.h.bf16 %v1521_v41 }
  0x1f   : > { %595 = vst [vmem:[#allocation7 + $0x48] sm:$0xf] %v593_v39  ;;  %v307_v50 = vpack.c.bf16 %v1846_v26, %v305_v44  ;;  %v635_v52 = vsel %vm195_vm0, %v629_v45, %v1875_v1  ;;  %v657_v58 = vsel %vm195_vm0, %v651_v51, %v1875_v1  ;;  %v365_v60 = vunpack.c.l.bf16 %v1507_v46  ;;  %v1529_v45 = vld [vmem:[%s1904_s28 + $0x78] sm:$0xff]  }
  0x20   : > { %617 = vst [vmem:[#allocation7 + $0x4c] sm:$0xf] %v615_v48  ;;  %287 = vst [vmem:[#allocation7 + $0x10] sm:$0xf] %v285_v49  ;;  %v637_v57 = vpack.c.bf16 %v1846_v26, %v635_v52  ;;  %v659_v62 = vpack.c.bf16 %v1846_v26, %v657_v58  ;;  %v327_v63 = vsel %vm195_vm0, %v321_v53, %v1875_v1  ;;  %v387_v2 = vunpack.c.h.bf16 %v1507_v46 }
  0x21   : > { %309 = vst [vmem:[#allocation7 + $0x14] sm:$0xf] %v307_v50  ;;  %1750 = vmatpush3.bf16.msra.mxu0 %v1818_v25  ;;  %1801 = vmatpush3.bf16.msra.mxu1 %v1818_v25  ;;  %v349_v0 = vsel %vm195_vm0, %v343_v54, %v1875_v1  ;;  %v329_v3 = vpack.c.bf16 %v1846_v26, %v327_v63  ;;  %v717_v7 = vunpack.c.l.bf16 %v1523_v56  ;;  %v739_v23 = vunpack.c.h.bf16 %v1523_v56 }
  0x22   : > { %1751 = vmatprep.subr.bf16.mxu0 %v1819_v47  ;;  %1794 = vmatprep.subr.bf16.mxu1 %v1819_v47  ;;  %639 = vst [vmem:[#allocation7 + $0x50] sm:$0xf] %v637_v57  ;;  %v351_v4 = vpack.c.bf16 %v1846_v26, %v349_v0  ;;  %v679_v5 = vsel %vm195_vm0, %v673_v55, %v1875_v1  ;;  %v1822_v11 = vld [vmem:[#allocation7] sm:$0xff]   ;;  %661 = vst [vmem:[#allocation7 + $0x54] sm:$0xf] %v659_v62  ;;  %v409_v24 = vunpack.c.l.bf16 %v1509_v8 }
  0x23   : > { %v681_v12 = vpack.c.bf16 %v1846_v26, %v679_v5  ;;  %v701_v13 = vsel %vm195_vm0, %v695_v59, %v1875_v1  ;;  %v371_v14 = vsel %vm195_vm0, %v365_v60, %v1875_v1  ;;  %v393_v15 = vsel %vm195_vm0, %v387_v2, %v1875_v1  ;;  %331 = vst [vmem:[#allocation7 + $0x18] sm:$0xf] %v329_v3 }
  0x24   : > { %353 = vst [vmem:[#allocation7 + $0x1c] sm:$0xf] %v351_v4  ;;  %v703_v16 = vpack.c.bf16 %v1846_v26, %v701_v13  ;;  %v373_v17 = vpack.c.bf16 %v1846_v26, %v371_v14  ;;  %v395_v18 = vpack.c.bf16 %v1846_v26, %v393_v15  ;;  %v723_v19 = vsel %vm195_vm0, %v717_v7, %v1875_v1  ;;  %v1823_v21 = vld [vmem:[#allocation7 + $0x40] sm:$0xff]  }
  0x25   : > { %1752 = vmatpush3.bf16.msra.mxu0 %v1819_v47  ;;  %1802 = vmatpush3.bf16.msra.mxu1 %v1819_v47  ;;  %683 = vst [vmem:[#allocation7 + $0x58] sm:$0xf] %v681_v12  ;;  %v725_v22 = vpack.c.bf16 %v1846_v26, %v723_v19  ;;  %v431_v25 = vunpack.c.h.bf16 %v1509_v8  ;;  %v761_v28 = vunpack.c.l.bf16 %v1525_v9  ;;  %v783_v29 = vunpack.c.h.bf16 %v1525_v9  ;;  %v1824_v50 = vld [vmem:[#allocation7 + $0x8] sm:$0xff]  }
  0x26   : > { %1753 = vmatprep.subr.bf16.mxu0 %v1820_v61  ;;  %1795 = vmatprep.subr.bf16.mxu1 %v1820_v61  ;;  %705 = vst [vmem:[#allocation7 + $0x5c] sm:$0xf] %v703_v16  ;;  %375 = vst [vmem:[#allocation7 + $0x20] sm:$0xf] %v373_v17  ;;  %v453_v30 = vunpack.c.l.bf16 %v1511_v10  ;;  %v475_v31 = vunpack.c.h.bf16 %v1511_v10  ;;  %v745_v32 = vsel %vm195_vm0, %v739_v23, %v1875_v1  ;;  %v805_v35 = vunpack.c.l.bf16 %v1527_v20  ;;  %v2069_v16 = vld [vmem:[%s2130_s1] ss:$0 sm:$0xff] }
  0x27   : > { %397 = vst [vmem:[#allocation7 + $0x24] sm:$0xf] %v395_v18  ;;  %1757 = vmatprep.mubr.bf16.mxu0 %v1822_v11  ;;  %1773 = vmatprep.mubr.bf16.mxu1 %v1823_v21  ;;  %727 = vst [vmem:[#allocation7 + $0x60] sm:$0xf] %v725_v22  ;;  %v415_v33 = vsel %vm195_vm0, %v409_v24, %v1875_v1  ;;  %v437_v34 = vsel %vm195_vm0, %v431_v25, %v1875_v1  ;;  %v827_v44 = vunpack.c.h.bf16 %v1527_v20  ;;  %v1825_v55 = vld [vmem:[#allocation7 + $0x48] sm:$0xff]  }
  0x28   : > { %v747_v37 = vpack.c.bf16 %v1846_v26, %v745_v32  ;;  %v417_v38 = vpack.c.bf16 %v1846_v26, %v415_v33  ;;  %v439_v39 = vpack.c.bf16 %v1846_v26, %v437_v34  ;;  %v767_v40 = vsel %vm195_vm0, %v761_v28, %v1875_v1  ;;  %v1826_v56 = vld [vmem:[#allocation7 + $0x10] sm:$0xff]  }
  0x29   : > { %1754 = vmatpush3.bf16.msra.mxu0 %v1820_v61  ;;  %1803 = vmatpush3.bf16.msra.mxu1 %v1820_v61  ;;  %v769_v41 = vpack.c.bf16 %v1846_v26, %v767_v40  ;;  %v789_v42 = vsel %vm195_vm0, %v783_v29, %v1875_v1  ;;  %v459_v43 = vsel %vm195_vm0, %v453_v30, %v1875_v1  ;;  %v497_v49 = vunpack.c.l.bf16 %v1513_v36  ;;  %v1827_v61 = vld [vmem:[#allocation7 + $0x50] sm:$0xff]  }
  0x2a   : > { %1755 = vmatprep.subr.bf16.mxu0 %v1821_v27  ;;  %1796 = vmatprep.subr.bf16.mxu1 %v1821_v27  ;;  %749 = vst [vmem:[#allocation7 + $0x64] sm:$0xf] %v747_v37  ;;  %419 = vst [vmem:[#allocation7 + $0x28] sm:$0xf] %v417_v38  ;;  %v791_v46 = vpack.c.bf16 %v1846_v26, %v789_v42  ;;  %v461_v47 = vpack.c.bf16 %v1846_v26, %v459_v43  ;;  %v519_v54 = vunpack.c.h.bf16 %v1513_v36 }
  0x2b   : > { %441 = vst [vmem:[#allocation7 + $0x2c] sm:$0xf] %v439_v39  ;;  %v481_v48 = vsel %vm195_vm0, %v475_v31, %v1875_v1  ;;  %771 = vst [vmem:[#allocation7 + $0x68] sm:$0xf] %v769_v41  ;;  %v811_v52 = vsel %vm195_vm0, %v805_v35, %v1875_v1  ;;  %v833_v53 = vsel %vm195_vm0, %v827_v44, %v1875_v1  ;;  %v849_v60 = vunpack.c.l.bf16 %v1529_v45  ;;  %v1828_v8 = vld [vmem:[#allocation7 + $0x18] sm:$0xff]  }
  0x2c   : > { %v483_v51 = vpack.c.bf16 %v1846_v26, %v481_v48  ;;  %793 = vst [vmem:[#allocation7 + $0x6c] sm:$0xf] %v791_v46  ;;  %463 = vst [vmem:[#allocation7 + $0x30] sm:$0xf] %v461_v47  ;;  %v813_v57 = vpack.c.bf16 %v1846_v26, %v811_v52  ;;  %v835_v58 = vpack.c.bf16 %v1846_v26, %v833_v53  ;;  %v871_v0 = vunpack.c.h.bf16 %v1529_v45 }
  0x2d   : > { %v503_v59 = vsel %vm195_vm0, %v497_v49, %v1875_v1  ;;  %1756 = vmatpush3.bf16.msra.mxu0 %v1821_v27  ;;  %1804 = vmatpush3.bf16.msra.mxu1 %v1821_v27  ;;  %v525_v63 = vsel %vm195_vm0, %v519_v54, %v1875_v1  ;;  %v855_v3 = vsel %vm195_vm0, %v849_v60, %v1875_v1  ;;  %v1829_v9 = vld [vmem:[#allocation7 + $0x58] sm:$0xff]  }
  0x2e   : > { %485 = vst [vmem:[#allocation7 + $0x34] sm:$0xf] %v483_v51  ;;  %v505_v62 = vpack.c.bf16 %v1846_v26, %v503_v59  ;;  %815 = vst [vmem:[#allocation7 + $0x70] sm:$0xf] %v813_v57  ;;  %v527_v2 = vpack.c.bf16 %v1846_v26, %v525_v63  ;;  %v857_v4 = vpack.c.bf16 %v1846_v26, %v855_v3  ;;  %v1830_v10 = vld [vmem:[#allocation7 + $0x20] sm:$0xff]  }
  0x2f   : > { %837 = vst [vmem:[#allocation7 + $0x74] sm:$0xf] %v835_v58  ;;  %v877_v5 = vsel %vm195_vm0, %v871_v0, %v1875_v1 }
  0x30   : > { %507 = vst [vmem:[#allocation7 + $0x38] sm:$0xf] %v505_v62  ;;  %1758 = vmatmul.mubr.bf16.vlgmr.msra.gmra.mrb[0].mxu0 %v1824_v50  ;;  %1774 = vmatmul.mubr.bf16.vlgmr.msra.gmra.mrb[0].mxu1 %v1825_v55  ;;  %529 = vst [vmem:[#allocation7 + $0x3c] sm:$0xf] %v527_v2  ;;  %v879_v7 = vpack.c.bf16 %v1846_v26, %v877_v5 }
  0x31   : > { %1761 = vmatprep.mubr.bf16.mxu0 %v1826_v56  ;;  %1777 = vmatprep.mubr.bf16.mxu1 %v1827_v61  ;;  %859 = vst [vmem:[#allocation7 + $0x78] sm:$0xf] %v857_v4  ;;  %v1831_v11 = vld [vmem:[#allocation7 + $0x60] sm:$0xff]  }
  0x32   : > { %881 = vst [vmem:[#allocation7 + $0x7c] sm:$0xf] %v879_v7  ;;  %v1832_v12 = vld [vmem:[#allocation7 + $0x28] sm:$0xff]  }
  0x33   : > { %v1833_v6 = vld [vmem:[#allocation7 + $0x68] sm:$0xff]  }
  0x35   : > { %v1834_v13 = vld [vmem:[#allocation7 + $0x30] sm:$0xff]  }
  0x36   : > { %v1835_v14 = vld [vmem:[#allocation7 + $0x70] sm:$0xff]  }
  0x37   : > { %v1836_v26 = vld [vmem:[#allocation7 + $0x38] sm:$0xff]  }
  0x38   : > { %1762 = vmatmul.mubr.bf16.gmra.mrb[4].mxu0 %v1828_v8  ;;  %1778 = vmatmul.mubr.bf16.gmra.mrb[4].mxu1 %v1829_v9 }
  0x39   : > { %1765 = vmatprep.mubr.bf16.mxu0 %v1830_v10  ;;  %1781 = vmatprep.mubr.bf16.mxu1 %v1831_v11  ;;  %v1837_v15 = vld [vmem:[#allocation7 + $0x78] sm:$0xff]  }
  0x40   : > { %1766 = vmatmul.mubr.bf16.gmra.mrb[8].mxu0 %v1832_v12  ;;  %1782 = vmatmul.mubr.bf16.gmra.mrb[8].mxu1 %v1833_v6 }
  0x41   : > { %1769 = vmatprep.mubr.bf16.mxu0 %v1834_v13  ;;  %1785 = vmatprep.mubr.bf16.mxu1 %v1835_v14 }
  0x48   : > { %1770 = vmatmul.mubr.bf16.gmra.mrb[12].mxu0 %v1836_v26  ;;  %1786 = vmatmul.mubr.bf16.gmra.mrb[12].mxu1 %v1837_v15 }
 0x103   : > { %v1759_v17 = vpop.f32.mrb[0].mxu0  ;;  %v1775_v18 = vpop.f32.mrb[0].mxu1 }
 0x104   : > { %v1125_v19 = vadd.f32 %v1759_v17, %v2069_v16  ;;  %v1189_v20 = vadd.f32 %v1775_v18, %v2069_v16  ;;  %v1116_v21 = vpop.f32.mrb[1].mxu0  ;;  %v1180_v22 = vpop.f32.mrb[1].mxu1 }
 0x105   : > { %v1117_v23 = vadd.f32 %v2069_v16, %v1116_v21  ;;  %v1181_v24 = vadd.f32 %v2069_v16, %v1180_v22  ;;  %v1760_v25 = vpop.f32.mrb[2].mxu0  ;;  %v1776_v27 = vpop.f32.mrb[2].mxu1 }
 0x106   : > { %v1128_v28 = vadd.f32 %v1760_v25, %v2069_v16  ;;  %v1192_v29 = vadd.f32 %v1776_v27, %v2069_v16  ;;  %v1119_v30 = vpop.f32.mrb[3].mxu0  ;;  %v1183_v31 = vpop.f32.mrb[3].mxu1  ;;  %v1245_v34 = vmax.f32 %v1125_v19, 0.0  ;;  %v1261_v35 = vmax.f32 %v1189_v20, 0.0 }
 0x107   : > { %v1120_v32 = vadd.f32 %v2069_v16, %v1119_v30  ;;  %v1184_v33 = vadd.f32 %v2069_v16, %v1183_v31  ;;  %v1243_v38 = vmax.f32 %v1117_v23, 0.0  ;;  %v1259_v39 = vmax.f32 %v1181_v24, 0.0 }
 0x108   : > { %v1246_v36 = vmax.f32 %v1128_v28, 0.0  ;;  %v1262_v37 = vmax.f32 %v1192_v29, 0.0 }
 0x109   : > { %v1244_v40 = vmax.f32 %v1120_v32, 0.0  ;;  %v1260_v41 = vmax.f32 %v1184_v33, 0.0 }
 0x10a   : > { %v1630_v42 = vpack.c.bf16 %v1246_v36, %v1245_v34  ;;  %v1670_v43 = vpack.c.bf16 %v1262_v37, %v1261_v35 }
 0x10b   : > { %v1625_v44 = vpack.c.bf16 %v1244_v40, %v1243_v38  ;;  %v1665_v45 = vpack.c.bf16 %v1260_v41, %v1259_v39  ;;  %v1763_v46 = vpop.f32.mrb[4].mxu0  ;;  %v1779_v47 = vpop.f32.mrb[4].mxu1 }
 0x10c   : > { %1702 = vst [vmem:[%s2084_s18 + $0x8] sm:$0xff] %v1630_v42   ;;  %1710 = vst [vmem:[%s2084_s18 + $0x48] sm:$0xff] %v1670_v43   ;;  %v1141_v48 = vadd.f32 %v1763_v46, %v2069_v16  ;;  %v1205_v49 = vadd.f32 %v1779_v47, %v2069_v16  ;;  %v1132_v50 = vpop.f32.mrb[5].mxu0  ;;  %v1196_v51 = vpop.f32.mrb[5].mxu1 }
 0x10d   : > { %1626 = vst [vmem:[%s2084_s18] sm:$0xff] %v1625_v44   ;;  %1709 = vst [vmem:[%s2084_s18 + $0x40] sm:$0xff] %v1665_v45   ;;  %v1133_v52 = vadd.f32 %v2069_v16, %v1132_v50  ;;  %v1197_v53 = vadd.f32 %v2069_v16, %v1196_v51  ;;  %v1764_v54 = vpop.f32.mrb[6].mxu0  ;;  %v1780_v55 = vpop.f32.mrb[6].mxu1 }
 0x10e   : > { %v1144_v56 = vadd.f32 %v1764_v54, %v2069_v16  ;;  %v1208_v57 = vadd.f32 %v1780_v55, %v2069_v16  ;;  %v1135_v58 = vpop.f32.mrb[7].mxu0  ;;  %v1199_v59 = vpop.f32.mrb[7].mxu1  ;;  %v1249_v62 = vmax.f32 %v1141_v48, 0.0  ;;  %v1265_v63 = vmax.f32 %v1205_v49, 0.0 }
 0x10f   : > { %v1136_v60 = vadd.f32 %v2069_v16, %v1135_v58  ;;  %v1200_v61 = vadd.f32 %v2069_v16, %v1199_v59  ;;  %v1247_v3 = vmax.f32 %v1133_v52, 0.0  ;;  %v1263_v4 = vmax.f32 %v1197_v53, 0.0 }
 0x110   : > { %v1250_v0 = vmax.f32 %v1144_v56, 0.0  ;;  %v1266_v2 = vmax.f32 %v1208_v57, 0.0 }
 0x111   : > { %v1248_v5 = vmax.f32 %v1136_v60, 0.0  ;;  %v1264_v7 = vmax.f32 %v1200_v61, 0.0 }
 0x112   : > { %v1640_v8 = vpack.c.bf16 %v1250_v0, %v1249_v62  ;;  %v1680_v9 = vpack.c.bf16 %v1266_v2, %v1265_v63 }
 0x113   : > { %v1635_v10 = vpack.c.bf16 %v1248_v5, %v1247_v3  ;;  %v1675_v11 = vpack.c.bf16 %v1264_v7, %v1263_v4  ;;  %v1767_v12 = vpop.f32.mrb[8].mxu0  ;;  %v1783_v6 = vpop.f32.mrb[8].mxu1 }
 0x114   : > { %1704 = vst [vmem:[%s2084_s18 + $0x18] sm:$0xff] %v1640_v8   ;;  %1712 = vst [vmem:[%s2084_s18 + $0x58] sm:$0xff] %v1680_v9   ;;  %v1157_v13 = vadd.f32 %v1767_v12, %v2069_v16  ;;  %v1221_v14 = vadd.f32 %v1783_v6, %v2069_v16  ;;  %v1148_v26 = vpop.f32.mrb[9].mxu0  ;;  %v1212_v15 = vpop.f32.mrb[9].mxu1 }
 0x115   : > { %1703 = vst [vmem:[%s2084_s18 + $0x10] sm:$0xff] %v1635_v10   ;;  %1711 = vst [vmem:[%s2084_s18 + $0x50] sm:$0xff] %v1675_v11   ;;  %v1149_v17 = vadd.f32 %v2069_v16, %v1148_v26  ;;  %v1213_v18 = vadd.f32 %v2069_v16, %v1212_v15  ;;  %v1768_v19 = vpop.f32.mrb[10].mxu0  ;;  %v1784_v20 = vpop.f32.mrb[10].mxu1 }
 0x116   : > { %v1160_v21 = vadd.f32 %v1768_v19, %v2069_v16  ;;  %v1224_v22 = vadd.f32 %v1784_v20, %v2069_v16  ;;  %v1151_v23 = vpop.f32.mrb[11].mxu0  ;;  %v1215_v24 = vpop.f32.mrb[11].mxu1  ;;  %v1253_v28 = vmax.f32 %v1157_v13, 0.0  ;;  %v1269_v29 = vmax.f32 %v1221_v14, 0.0 }
 0x117   : > { %v1152_v25 = vadd.f32 %v2069_v16, %v1151_v23  ;;  %v1216_v27 = vadd.f32 %v2069_v16, %v1215_v24  ;;  %v1251_v32 = vmax.f32 %v1149_v17, 0.0  ;;  %v1267_v33 = vmax.f32 %v1213_v18, 0.0 }
 0x118   : > { %v1254_v30 = vmax.f32 %v1160_v21, 0.0  ;;  %v1270_v31 = vmax.f32 %v1224_v22, 0.0 }
 0x119   : > { %v1252_v34 = vmax.f32 %v1152_v25, 0.0  ;;  %v1268_v35 = vmax.f32 %v1216_v27, 0.0 }
 0x11a   : > { %v1650_v36 = vpack.c.bf16 %v1254_v30, %v1253_v28  ;;  %v1690_v37 = vpack.c.bf16 %v1270_v31, %v1269_v29 }
 0x11b   : > { %v1645_v38 = vpack.c.bf16 %v1252_v34, %v1251_v32  ;;  %v1685_v39 = vpack.c.bf16 %v1268_v35, %v1267_v33  ;;  %v1771_v40 = vpop.f32.mrb[12].mxu0  ;;  %v1787_v41 = vpop.f32.mrb[12].mxu1 }
 0x11c   : > { %1706 = vst [vmem:[%s2084_s18 + $0x28] sm:$0xff] %v1650_v36   ;;  %1714 = vst [vmem:[%s2084_s18 + $0x68] sm:$0xff] %v1690_v37   ;;  %v1173_v42 = vadd.f32 %v1771_v40, %v2069_v16  ;;  %v1237_v43 = vadd.f32 %v1787_v41, %v2069_v16  ;;  %v1164_v44 = vpop.f32.mrb[13].mxu0  ;;  %v1228_v45 = vpop.f32.mrb[13].mxu1 }
 0x11d   : > { %1705 = vst [vmem:[%s2084_s18 + $0x20] sm:$0xff] %v1645_v38   ;;  %1713 = vst [vmem:[%s2084_s18 + $0x60] sm:$0xff] %v1685_v39   ;;  %v1165_v46 = vadd.f32 %v2069_v16, %v1164_v44  ;;  %v1229_v47 = vadd.f32 %v2069_v16, %v1228_v45  ;;  %v1772_v48 = vpop.f32.mrb[14].mxu0  ;;  %v1788_v49 = vpop.f32.mrb[14].mxu1 }
 0x11e   : > { %v1176_v50 = vadd.f32 %v1772_v48, %v2069_v16  ;;  %v1240_v51 = vadd.f32 %v1788_v49, %v2069_v16  ;;  %v1167_v52 = vpop.f32.mrb[15].mxu0  ;;  %v1231_v53 = vpop.f32.mrb[15].mxu1  ;;  %v1257_v56 = vmax.f32 %v1173_v42, 0.0  ;;  %v1273_v57 = vmax.f32 %v1237_v43, 0.0 }
 0x11f   : > { %v1168_v54 = vadd.f32 %v2069_v16, %v1167_v52  ;;  %v1232_v55 = vadd.f32 %v2069_v16, %v1231_v53  ;;  %v1255_v60 = vmax.f32 %v1165_v46, 0.0  ;;  %v1271_v61 = vmax.f32 %v1229_v47, 0.0 }
 0x120   : > { %v1258_v58 = vmax.f32 %v1176_v50, 0.0  ;;  %v1274_v59 = vmax.f32 %v1240_v51, 0.0 }
 0x121   : > { %v1256_v62 = vmax.f32 %v1168_v54, 0.0  ;;  %v1272_v63 = vmax.f32 %v1232_v55, 0.0 }
 0x122   : > { %v1660_v0 = vpack.c.bf16 %v1258_v58, %v1257_v56  ;;  %v1700_v2 = vpack.c.bf16 %v1274_v59, %v1273_v57 }
 0x123   : > { %v1655_v3 = vpack.c.bf16 %v1256_v62, %v1255_v60  ;;  %v1695_v4 = vpack.c.bf16 %v1272_v63, %v1271_v61 }
 0x124   : > { %1708 = vst [vmem:[%s2084_s18 + $0x38] sm:$0xff] %v1660_v0   ;;  %1716 = vst [vmem:[%s2084_s18 + $0x78] sm:$0xff] %v1700_v2  }
 0x125   : > { %1707 = vst [vmem:[%s2084_s18 + $0x30] sm:$0xff] %v1655_v3   ;;  %1715 = vst [vmem:[%s2084_s18 + $0x70] sm:$0xff] %v1695_v4  }
 0x126 PF: > { %s19_s17 = sadd.s32 1, %s1844_s17  }
 0x127   : > { %p16_p4 = scmp.ge.s32.totalorder %s19_s17, 4  }
 0x129   :  { %18 = sbr.rel (!%p16_p4) target bundleno = 3 (0x3), region = 124 }

// kernel: _lambda_.15
= control target key start
LH: loop header
LB: loop body
LE: loop exit
PB: predicated region body
PF: predicated region fallthrough
CT: control target
= control target key end

     0   :  { %s809_s17 = smov 0   ;;  %s876_s0 = inlined_call_operand.vmem [shape: bf16[128,128], index: 0, kind: input, shape index: {}]   ;;  %s877_s1 = inlined_call_operand.vmem [shape: f32[1,128], index: 1, kind: input, shape index: {}]   ;;  %s878_s2 = inlined_call_operand.vmem [shape: bf16[128,72], index: 2, kind: input, shape index: {}]   ;;  %s879_s3 = inlined_call_operand.<no memory space> [shape: bf16[], index: 3, kind: input, shape index: {}]   ;;  %s880_s4 = inlined_call_operand.vmem [shape: bf16[128,128], index: 4, kind: output, shape index: {}]  }
   0x1   :  { %v9_v0 = vstv %s879_s3 }
   0x2   :  { %v807_v1 = vunpack.i.l.bf16 %v9_v0 }
   0x3 LB: > { %s627_s18 = sadd.s32 4294967295, %s776_s17   ;;  %p631_p0 = scmp.ge.s32.totalorder %s776_s17, 1  ;;  %s776_s17 = sphi %s809_s17, %s19_s17  }
   0x4   : > { %p144_p1 = scmp.lt.s32.totalorder %s776_s17, 3 }
   0x6   : > { %p145_p2 = pnand %p631_p0, %p144_p1 }
   0x8   : > { %148 = sbr.rel (%p145_p2) target bundleno = 270 (0x10e), region = 32 }
   0xf   : > { %v758_v2 = vld [vmem:[%s876_s0] sm:$0xff]   ;;  %s632_s3 = sshll.u32 %s627_s18, 3  ;;  %v192_v3 = vlaneseq  ;;  %v759_v4 = vld [vmem:[%s876_s0 + $0x8] sm:$0xff]   ;;  %v760_v5 = vld [vmem:[%s876_s0 + $0x10] sm:$0xff]   ;;  %v778_v24 = vmov 0.0  }
  0x10   : > { %p169_p3 = scmp.lt.s32.totalorder %s632_s3, 15  ;;  %709 = vmatprep.subr.bf16.mxu0 %v758_v2  ;;  %733 = vmatprep.subr.bf16.mxu1 %v758_v2  ;;  %v761_v7 = vld [vmem:[%s876_s0 + $0x18] sm:$0xff]   ;;  %v762_v23 = vld [vmem:[%s876_s0 + $0x20] sm:$0xff]   ;;  %v763_v37 = vld [vmem:[%s876_s0 + $0x28] sm:$0xff]  }
  0x11   : > { %710 = vmatpush3.bf16.msra.mxu0 %v758_v2  ;;  %741 = vmatpush3.bf16.msra.mxu1 %v758_v2  ;;  %v193_v6 = vand.u32 127, %v192_v3  ;;  %v764_v39 = vld [vmem:[%s876_s0 + $0x30] sm:$0xff]   ;;  %v765_v42 = vld [vmem:[%s876_s0 + $0x38] sm:$0xff]   ;;  %v643_v45 = vld [vmem:[%s877_s1] ss:$0 sm:$0xff] }
  0x12   : > { %s882_s3 = smov (!%p169_p3, %s632_s3), 15  ;;  %711 = vmatprep.subr.bf16.mxu0 %v759_v4  ;;  %734 = vmatprep.subr.bf16.mxu1 %v759_v4 }
  0x13   : > { %s633_s25 = sshll.u32 %s882_s3, 2  ;;  %vm195_vm0 = vcmp.lt.s32.totalorder %v193_v6, 72 }
  0x14   : > { %s172_s28 = scalar_lea.vmem %s878_s2, %s633_s25  ;;  %s178_s18 = scalar_lea.vmem %s880_s4, %s633_s25 }
  0x15   : > { %712 = vmatpush3.bf16.msra.mxu0 %v759_v4  ;;  %742 = vmatpush3.bf16.msra.mxu1 %v759_v4  ;;  %v189_v8 = vld [vmem:[%s172_s28] sm:$0xff]   ;;  %v639_v9 = vld [vmem:[%s172_s28 + $0x10] sm:$0xff]   ;;  %v637_v10 = vld [vmem:[%s172_s28 + $0x8] sm:$0xff]  }
  0x16   : > { %713 = vmatprep.subr.bf16.mxu0 %v760_v5  ;;  %735 = vmatprep.subr.bf16.mxu1 %v760_v5  ;;  %v190_v11 = vunpack.c.l.bf16 %v189_v8  ;;  %v211_v12 = vunpack.c.h.bf16 %v189_v8  ;;  %v277_v13 = vunpack.c.l.bf16 %v639_v9  ;;  %v299_v14 = vunpack.c.h.bf16 %v639_v9  ;;  %v641_v15 = vld [vmem:[%s172_s28 + $0x18] sm:$0xff]  }
  0x17   : > { %v233_v16 = vunpack.c.l.bf16 %v637_v10  ;;  %v255_v17 = vunpack.c.h.bf16 %v637_v10  ;;  %v321_v18 = vunpack.c.l.bf16 %v641_v15  ;;  %v343_v22 = vunpack.c.h.bf16 %v641_v15 }
  0x18   : > { %v196_v19 = vsel %vm195_vm0, %v190_v11, %v807_v1  ;;  %v217_v20 = vsel %vm195_vm0, %v211_v12, %v807_v1  ;;  %v283_v21 = vsel %vm195_vm0, %v277_v13, %v807_v1  ;;  %v305_v28 = vsel %vm195_vm0, %v299_v14, %v807_v1 }
  0x19   : > { %714 = vmatpush3.bf16.msra.mxu0 %v760_v5  ;;  %743 = vmatpush3.bf16.msra.mxu1 %v760_v5  ;;  %v197_v25 = vpack.c.bf16 %v778_v24, %v196_v19  ;;  %v219_v26 = vpack.c.bf16 %v778_v24, %v217_v20  ;;  %v285_v27 = vpack.c.bf16 %v778_v24, %v283_v21 }
  0x1a   : > { %715 = vmatprep.subr.bf16.mxu0 %v761_v7  ;;  %736 = vmatprep.subr.bf16.mxu1 %v761_v7  ;;  %v239_v29 = vsel %vm195_vm0, %v233_v16, %v807_v1  ;;  %v261_v30 = vsel %vm195_vm0, %v255_v17, %v807_v1  ;;  %v327_v31 = vsel %vm195_vm0, %v321_v18, %v807_v1 }
  0x1b   : > { %199 = vst [vmem:[#allocation7] sm:$0xf] %v197_v25  ;;  %221 = vst [vmem:[#allocation7 + $0x4] sm:$0xf] %v219_v26  ;;  %v307_v32 = vpack.c.bf16 %v778_v24, %v305_v28  ;;  %v241_v33 = vpack.c.bf16 %v778_v24, %v239_v29  ;;  %v263_v34 = vpack.c.bf16 %v778_v24, %v261_v30 }
  0x1c   : > { %287 = vst [vmem:[#allocation7 + $0x10] sm:$0xf] %v285_v27  ;;  %v329_v35 = vpack.c.bf16 %v778_v24, %v327_v31  ;;  %v349_v36 = vsel %vm195_vm0, %v343_v22, %v807_v1 }
  0x1d   : > { %716 = vmatpush3.bf16.msra.mxu0 %v761_v7  ;;  %744 = vmatpush3.bf16.msra.mxu1 %v761_v7  ;;  %309 = vst [vmem:[#allocation7 + $0x14] sm:$0xf] %v307_v32  ;;  %243 = vst [vmem:[#allocation7 + $0x8] sm:$0xf] %v241_v33  ;;  %v351_v38 = vpack.c.bf16 %v778_v24, %v349_v36 }
  0x1e   : > { %717 = vmatprep.subr.bf16.mxu0 %v762_v23  ;;  %737 = vmatprep.subr.bf16.mxu1 %v762_v23  ;;  %265 = vst [vmem:[#allocation7 + $0xc] sm:$0xf] %v263_v34  ;;  %331 = vst [vmem:[#allocation7 + $0x18] sm:$0xf] %v329_v35 }
  0x1f   : > { %353 = vst [vmem:[#allocation7 + $0x1c] sm:$0xf] %v351_v38 }
  0x21   : > { %718 = vmatpush3.bf16.msra.mxu0 %v762_v23  ;;  %745 = vmatpush3.bf16.msra.mxu1 %v762_v23 }
  0x22   : > { %719 = vmatprep.subr.bf16.mxu0 %v763_v37  ;;  %738 = vmatprep.subr.bf16.mxu1 %v763_v37  ;;  %v766_v40 = vld [vmem:[#allocation7] sm:$0xff]  }
  0x23   : > { %725 = vmatprep.mubr.bf16.mxu0 %v766_v40 }
  0x24   : > { %v767_v41 = vld [vmem:[#allocation7 + $0x10] sm:$0xff]  }
  0x25   : > { %720 = vmatpush3.bf16.msra.mxu0 %v763_v37  ;;  %746 = vmatpush3.bf16.msra.mxu1 %v763_v37  ;;  %v768_v43 = vld [vmem:[#allocation7 + $0x8] sm:$0xff]  }
  0x26   : > { %721 = vmatprep.subr.bf16.mxu0 %v764_v39  ;;  %739 = vmatprep.subr.bf16.mxu1 %v764_v39  ;;  %v769_v44 = vld [vmem:[#allocation7 + $0x18] sm:$0xff]  }
  0x27   : > { %729 = vmatprep.mubr.bf16.mxu1 %v767_v41 }
  0x29   : > { %722 = vmatpush3.bf16.msra.mxu0 %v764_v39  ;;  %747 = vmatpush3.bf16.msra.mxu1 %v764_v39 }
  0x2a   : > { %723 = vmatprep.subr.bf16.mxu0 %v765_v42  ;;  %740 = vmatprep.subr.bf16.mxu1 %v765_v42 }
  0x2d   : > { %724 = vmatpush3.bf16.msra.mxu0 %v765_v42  ;;  %748 = vmatpush3.bf16.msra.mxu1 %v765_v42 }
  0x30   : > { %726 = vmatmul.mubr.bf16.vlgmr.msra.gmra.mrb[0].mxu0 %v768_v43  ;;  %730 = vmatmul.mubr.bf16.vlgmr.msra.gmra.mrb[0].mxu1 %v769_v44 }
 0x103   : > { %v727_v46 = vpop.f32.mrb[0].mxu0  ;;  %v731_v47 = vpop.f32.mrb[0].mxu1 }
 0x104   : > { %v501_v48 = vadd.f32 %v727_v46, %v643_v45  ;;  %v517_v49 = vadd.f32 %v731_v47, %v643_v45  ;;  %v492_v50 = vpop.f32.mrb[1].mxu0  ;;  %v508_v51 = vpop.f32.mrb[1].mxu1 }
 0x105   : > { %v493_v52 = vadd.f32 %v643_v45, %v492_v50  ;;  %v509_v53 = vadd.f32 %v643_v45, %v508_v51  ;;  %v728_v54 = vpop.f32.mrb[2].mxu0  ;;  %v732_v55 = vpop.f32.mrb[2].mxu1 }
 0x106   : > { %v504_v56 = vadd.f32 %v728_v54, %v643_v45  ;;  %v520_v57 = vadd.f32 %v732_v55, %v643_v45  ;;  %v495_v58 = vpop.f32.mrb[3].mxu0  ;;  %v511_v59 = vpop.f32.mrb[3].mxu1  ;;  %v525_v62 = vmax.f32 %v501_v48, 0.0  ;;  %v529_v63 = vmax.f32 %v517_v49, 0.0 }
 0x107   : > { %v496_v60 = vadd.f32 %v643_v45, %v495_v58  ;;  %v512_v61 = vadd.f32 %v643_v45, %v511_v59  ;;  %v523_v3 = vmax.f32 %v493_v52, 0.0  ;;  %v527_v4 = vmax.f32 %v509_v53, 0.0 }
 0x108   : > { %v526_v0 = vmax.f32 %v504_v56, 0.0  ;;  %v530_v2 = vmax.f32 %v520_v57, 0.0 }
 0x109   : > { %v524_v5 = vmax.f32 %v496_v60, 0.0  ;;  %v528_v6 = vmax.f32 %v512_v61, 0.0 }
 0x10a   : > { %v682_v7 = vpack.c.bf16 %v526_v0, %v525_v62  ;;  %v692_v8 = vpack.c.bf16 %v530_v2, %v529_v63 }
 0x10b   : > { %v677_v9 = vpack.c.bf16 %v524_v5, %v523_v3  ;;  %v687_v10 = vpack.c.bf16 %v528_v6, %v527_v4 }
 0x10c   : > { %694 = vst [vmem:[%s178_s18 + $0x8] sm:$0xff] %v682_v7   ;;  %696 = vst [vmem:[%s178_s18 + $0x18] sm:$0xff] %v692_v8  }
 0x10d   : > { %678 = vst [vmem:[%s178_s18] sm:$0xff] %v677_v9   ;;  %695 = vst [vmem:[%s178_s18 + $0x10] sm:$0xff] %v687_v10  }
 0x10e PF: > { %s19_s17 = sadd.s32 1, %s776_s17  }
 0x10f   : > { %p16_p4 = scmp.ge.s32.totalorder %s19_s17, 4  }
 0x111   :  { %18 = sbr.rel (!%p16_p4) target bundleno = 3 (0x3), region = 76 }

// kernel: _lambda_.14
= control target key start
LH: loop header
LB: loop body
LE: loop exit
PB: predicated region body
PF: predicated region fallthrough
CT: control target
= control target key end

     0   :  { %s1038_s17 = smov 0   ;;  %s1151_s0 = inlined_call_operand.vmem [shape: bf16[256,128], index: 0, kind: input, shape index: {}]   ;;  %s1152_s1 = inlined_call_operand.vmem [shape: f32[1,128], index: 1, kind: input, shape index: {}]   ;;  %s1153_s2 = inlined_call_operand.vmem [shape: bf16[128,144], index: 2, kind: input, shape index: {}]   ;;  %s1154_s3 = inlined_call_operand.<no memory space> [shape: bf16[], index: 3, kind: input, shape index: {}]   ;;  %s1155_s4 = inlined_call_operand.vmem [shape: bf16[128,128], index: 4, kind: output, shape index: {}]  }
   0x1   :  { %v9_v0 = vstv %s1154_s3 }
   0x2   :  { %v1036_v1 = vunpack.i.l.bf16 %v9_v0 }
   0x3 LB: > { %s814_s18 = sadd.s32 4294967295, %s1005_s17   ;;  %p818_p0 = scmp.ge.s32.totalorder %s1005_s17, 1  ;;  %s1005_s17 = sphi %s1038_s17, %s19_s17  }
   0x4   : > { %p145_p1 = scmp.lt.s32.totalorder %s1005_s17, 3 }
   0x6   : > { %p146_p2 = pnand %p818_p0, %p145_p1 }
   0x8   : > { %149 = sbr.rel (%p146_p2) target bundleno = 281 (0x119), region = 32 }
   0xf   : > { %v971_v2 = vld [vmem:[%s1151_s0 + $0x40] sm:$0xff]   ;;  %s819_s3 = sshll.u32 %s814_s18, 3  ;;  %v973_v4 = vld [vmem:[%s1151_s0 + $0x48] sm:$0xff]   ;;  %v207_v5 = vlaneseq  ;;  %v975_v7 = vld [vmem:[%s1151_s0 + $0x50] sm:$0xff]   ;;  %v1007_v38 = vmov 0.0  }
  0x10   : > { %v972_v3 = vld [vmem:[%s1151_s0] sm:$0xff]   ;;  %906 = vmatprep.subr.bf16.mxu0 %v971_v2  ;;  %946 = vmatprep.subr.bf16.mxu1 %v971_v2  ;;  %p171_p3 = scmp.lt.s32.totalorder %s819_s3, 15  ;;  %v974_v6 = vld [vmem:[%s1151_s0 + $0x8] sm:$0xff]   ;;  %v976_v9 = vld [vmem:[%s1151_s0 + $0x10] sm:$0xff]  }
  0x11   : > { %907 = vmatpush3.bf16.msra.mxu0 %v972_v3  ;;  %954 = vmatpush3.bf16.msra.mxu1 %v972_v3  ;;  %v208_v8 = vand.u32 127, %v207_v5  ;;  %v977_v10 = vld [vmem:[%s1151_s0 + $0x58] sm:$0xff]   ;;  %v979_v13 = vld [vmem:[%s1151_s0 + $0x60] sm:$0xff]   ;;  %v981_v15 = vld [vmem:[%s1151_s0 + $0x68] sm:$0xff]  }
  0x12   : > { %908 = vmatprep.subr.bf16.mxu0 %v973_v4  ;;  %947 = vmatprep.subr.bf16.mxu1 %v973_v4  ;;  %s1157_s3 = smov (!%p171_p3, %s819_s3), 15  ;;  %v978_v12 = vld [vmem:[%s1151_s0 + $0x18] sm:$0xff]   ;;  %v980_v14 = vld [vmem:[%s1151_s0 + $0x20] sm:$0xff]   ;;  %v982_v19 = vld [vmem:[%s1151_s0 + $0x28] sm:$0xff]  }
  0x13   : > { %s874_s7 = sshll.u32 %s1157_s3, 3  ;;  %v1070_v11 = vadd.s32 128, %v208_v8  ;;  %v983_v37 = vld [vmem:[%s1151_s0 + $0x70] sm:$0xff]   ;;  %v985_v54 = vld [vmem:[%s1151_s0 + $0x78] sm:$0xff]   ;;  %v839_v5 = vld [vmem:[%s1152_s1] ss:$0 sm:$0xff] }
  0x14   : > { %s1081_s14 = scalar_lea.vmem %s1153_s2, %s874_s7  ;;  %v984_v51 = vld [vmem:[%s1151_s0 + $0x30] sm:$0xff]   ;;  %v986_v57 = vld [vmem:[%s1151_s0 + $0x38] sm:$0xff]   ;;  %s823_s6 = sshll.u32 %s1157_s3, 2 }
  0x15   : > { %909 = vmatpush3.bf16.msra.mxu0 %v974_v6  ;;  %955 = vmatpush3.bf16.msra.mxu1 %v974_v6  ;;  %vm210_vm0 = vcmp.lt.s32.totalorder %v1070_v11, 144  ;;  %v183_v16 = vld [vmem:[%s1081_s14] sm:$0xf]  ;;  %v824_v17 = vld [vmem:[%s1081_s14 + $0x4] ss:$8 sps:$4 sm:$0xff]   ;;  %s181_s9 = scalar_lea.vmem %s1155_s4, %s823_s6 }
  0x16   : > { %910 = vmatprep.subr.bf16.mxu0 %v975_v7  ;;  %948 = vmatprep.subr.bf16.mxu1 %v975_v7  ;;  %v825_v18 = vld [vmem:[%s1081_s14 + $0x8] sm:$0xf]  ;;  %193 = vst [vmem:[#allocation7] sm:$0xf] %v183_v16  ;;  %v205_v20 = vunpack.c.l.bf16 %v824_v17  ;;  %v240_v21 = vunpack.c.h.bf16 %v824_v17  ;;  %v831_v22 = vld [vmem:[%s1081_s14 + $0x20] sm:$0xf] }
  0x17   : > { %228 = vst [vmem:[#allocation7 + $0x8] sm:$0xf] %v825_v18  ;;  %v832_v23 = vld [vmem:[%s1081_s14 + $0x24] ss:$8 sps:$4 sm:$0xff]   ;;  %v833_v24 = vld [vmem:[%s1081_s14 + $0x28] sm:$0xf] }
  0x18   : > { %333 = vst [vmem:[#allocation7 + $0x20] sm:$0xf] %v831_v22  ;;  %v345_v25 = vunpack.c.l.bf16 %v832_v23  ;;  %368 = vst [vmem:[#allocation7 + $0x28] sm:$0xf] %v833_v24  ;;  %v380_v26 = vunpack.c.h.bf16 %v832_v23  ;;  %v827_v27 = vld [vmem:[%s1081_s14 + $0x10] sm:$0xf]  ;;  %v211_v30 = vsel %vm210_vm0, %v205_v20, %v1036_v1  ;;  %v246_v31 = vsel %vm210_vm0, %v240_v21, %v1036_v1 }
  0x19   : > { %911 = vmatpush3.bf16.msra.mxu0 %v976_v9  ;;  %956 = vmatpush3.bf16.msra.mxu1 %v976_v9  ;;  %v828_v28 = vld [vmem:[%s1081_s14 + $0x14] ss:$8 sps:$4 sm:$0xff]   ;;  %v829_v29 = vld [vmem:[%s1081_s14 + $0x18] sm:$0xf]  ;;  %263 = vst [vmem:[#allocation7 + $0x10] sm:$0xf] %v827_v27  ;;  %v213_v39 = vpack.c.bf16 %v1007_v38, %v211_v30  ;;  %v248_v40 = vpack.c.bf16 %v1007_v38, %v246_v31 }
  0x1a   : > { %912 = vmatprep.subr.bf16.mxu0 %v977_v10  ;;  %949 = vmatprep.subr.bf16.mxu1 %v977_v10  ;;  %v275_v32 = vunpack.c.l.bf16 %v828_v28  ;;  %298 = vst [vmem:[#allocation7 + $0x18] sm:$0xf] %v829_v29  ;;  %v310_v33 = vunpack.c.h.bf16 %v828_v28  ;;  %v835_v34 = vld [vmem:[%s1081_s14 + $0x30] sm:$0xf]  ;;  %v836_v35 = vld [vmem:[%s1081_s14 + $0x34] ss:$8 sps:$4 sm:$0xff]   ;;  %v351_v41 = vsel %vm210_vm0, %v345_v25, %v1036_v1  ;;  %v386_v44 = vsel %vm210_vm0, %v380_v26, %v1036_v1 }
  0x1b   : > { %v837_v36 = vld [vmem:[%s1081_s14 + $0x38] sm:$0xf]  ;;  %403 = vst [vmem:[#allocation7 + $0x30] sm:$0xf] %v835_v34  ;;  %v415_v42 = vunpack.c.l.bf16 %v836_v35  ;;  %v353_v43 = vpack.c.bf16 %v1007_v38, %v351_v41  ;;  %215 = vst [vmem:[#allocation7 + $0x4] sm:$0xf] %v213_v39  ;;  %v388_v47 = vpack.c.bf16 %v1007_v38, %v386_v44  ;;  %v450_v53 = vunpack.c.h.bf16 %v836_v35 }
  0x1c   : > { %438 = vst [vmem:[#allocation7 + $0x38] sm:$0xf] %v837_v36  ;;  %v281_v45 = vsel %vm210_vm0, %v275_v32, %v1036_v1  ;;  %v316_v46 = vsel %vm210_vm0, %v310_v33, %v1036_v1  ;;  %250 = vst [vmem:[#allocation7 + $0xc] sm:$0xf] %v248_v40 }
  0x1d   : > { %913 = vmatpush3.bf16.msra.mxu0 %v978_v12  ;;  %957 = vmatpush3.bf16.msra.mxu1 %v978_v12  ;;  %v283_v48 = vpack.c.bf16 %v1007_v38, %v281_v45  ;;  %v318_v49 = vpack.c.bf16 %v1007_v38, %v316_v46  ;;  %v421_v50 = vsel %vm210_vm0, %v415_v42, %v1036_v1 }
  0x1e   : > { %914 = vmatprep.subr.bf16.mxu0 %v979_v13  ;;  %950 = vmatprep.subr.bf16.mxu1 %v979_v13  ;;  %355 = vst [vmem:[#allocation7 + $0x24] sm:$0xf] %v353_v43  ;;  %v423_v52 = vpack.c.bf16 %v1007_v38, %v421_v50  ;;  %390 = vst [vmem:[#allocation7 + $0x2c] sm:$0xf] %v388_v47  ;;  %v456_v55 = vsel %vm210_vm0, %v450_v53, %v1036_v1  ;;  %v987_v58 = vld [vmem:[#allocation7] ss:$8 sps:$4 sm:$0xff]  }
  0x1f   : > { %285 = vst [vmem:[#allocation7 + $0x14] sm:$0xf] %v283_v48  ;;  %320 = vst [vmem:[#allocation7 + $0x1c] sm:$0xf] %v318_v49  ;;  %v458_v56 = vpack.c.bf16 %v1007_v38, %v456_v55  ;;  %v990_v60 = vld [vmem:[#allocation7 + $0x20] ss:$8 sps:$4 sm:$0xff]  }
  0x20   : > { %425 = vst [vmem:[#allocation7 + $0x34] sm:$0xf] %v423_v52 }
  0x21   : > { %915 = vmatpush3.bf16.msra.mxu0 %v980_v14  ;;  %958 = vmatpush3.bf16.msra.mxu1 %v980_v14  ;;  %460 = vst [vmem:[#allocation7 + $0x3c] sm:$0xf] %v458_v56  ;;  %v997_v0 = vld [vmem:[#allocation7 + $0x10] ss:$8 sps:$4 sm:$0xff]  }
  0x22   : > { %916 = vmatprep.subr.bf16.mxu0 %v981_v15  ;;  %951 = vmatprep.subr.bf16.mxu1 %v981_v15 }
  0x23   : > { %v989_v59 = vld [vmem:[#allocation7 + $0x4] ss:$8 sps:$4 sm:$0xff]   ;;  %v998_v2 = vld [vmem:[#allocation7 + $0x30] ss:$8 sps:$4 sm:$0xff]  }
  0x24   : > { %677 = vmatprep.mubr.bf16.mxu0 %v989_v59 }
  0x25   : > { %917 = vmatpush3.bf16.msra.mxu0 %v982_v19  ;;  %959 = vmatpush3.bf16.msra.mxu1 %v982_v19  ;;  %v992_v61 = vld [vmem:[#allocation7 + $0x24] ss:$8 sps:$4 sm:$0xff]  }
  0x26   : > { %918 = vmatprep.subr.bf16.mxu0 %v983_v37  ;;  %952 = vmatprep.subr.bf16.mxu1 %v983_v37  ;;  %v993_v62 = vld [vmem:[#allocation7 + $0x14] ss:$8 sps:$4 sm:$0xff]  }
  0x27   : > { %693 = vmatprep.mubr.bf16.mxu1 %v992_v61 }
  0x28   : > { %v995_v63 = vld [vmem:[#allocation7 + $0x34] ss:$8 sps:$4 sm:$0xff]  }
  0x29   : > { %919 = vmatpush3.bf16.msra.mxu0 %v984_v51  ;;  %960 = vmatpush3.bf16.msra.mxu1 %v984_v51 }
  0x2a   : > { %920 = vmatprep.subr.bf16.mxu0 %v985_v54  ;;  %953 = vmatprep.subr.bf16.mxu1 %v985_v54 }
  0x2d   : > { %921 = vmatpush3.bf16.msra.mxu0 %v986_v57  ;;  %961 = vmatpush3.bf16.msra.mxu1 %v986_v57 }
  0x30   : > { %678 = vmatmul.mubr.bf16.vlgmr.msra.gmra.mrb[0].mxu0 %v987_v58  ;;  %694 = vmatmul.mubr.bf16.vlgmr.msra.gmra.mrb[0].mxu1 %v990_v60 }
  0x31   : > { %685 = vmatprep.mubr.bf16.mxu0 %v993_v62  ;;  %701 = vmatprep.mubr.bf16.mxu1 %v995_v63 }
  0x38   : > { %686 = vmatmul.mubr.bf16.gmra.mrb[4].mxu0 %v997_v0  ;;  %702 = vmatmul.mubr.bf16.gmra.mrb[4].mxu1 %v998_v2 }
 0x103   : > { %v922_v3 = vpop.f32.mrb[0].mxu0  ;;  %v934_v4 = vpop.f32.mrb[0].mxu1 }
 0x104   : > { %v923_v6 = vpop.f32.mrb[1].mxu0  ;;  %v935_v7 = vpop.f32.mrb[1].mxu1 }
 0x105   : > { %v924_v8 = vadd.f32 %v923_v6, %v922_v3  ;;  %v936_v9 = vadd.f32 %v935_v7, %v934_v4  ;;  %v925_v10 = vpop.f32.mrb[2].mxu0  ;;  %v937_v11 = vpop.f32.mrb[2].mxu1 }
 0x106   : > { %v926_v12 = vpop.f32.mrb[3].mxu0  ;;  %v938_v13 = vpop.f32.mrb[3].mxu1 }
 0x107   : > { %v680_v14 = vadd.f32 %v924_v8, %v839_v5  ;;  %v696_v15 = vadd.f32 %v936_v9, %v839_v5  ;;  %v927_v16 = vadd.f32 %v926_v12, %v925_v10  ;;  %v939_v17 = vadd.f32 %v938_v13, %v937_v11 }
 0x109   : > { %v683_v18 = vadd.f32 %v927_v16, %v839_v5  ;;  %v699_v19 = vadd.f32 %v939_v17, %v839_v5  ;;  %v710_v20 = vmax.f32 %v680_v14, 0.0  ;;  %v714_v21 = vmax.f32 %v696_v15, 0.0 }
 0x10b   : > { %v711_v22 = vmax.f32 %v683_v18, 0.0  ;;  %v715_v23 = vmax.f32 %v699_v19, 0.0  ;;  %v928_v24 = vpop.f32.mrb[4].mxu0  ;;  %v940_v25 = vpop.f32.mrb[4].mxu1 }
 0x10c   : > { %v929_v26 = vpop.f32.mrb[5].mxu0  ;;  %v941_v27 = vpop.f32.mrb[5].mxu1 }
 0x10d   : > { %v886_v28 = vpack.c.bf16 %v711_v22, %v710_v20  ;;  %v896_v29 = vpack.c.bf16 %v715_v23, %v714_v21  ;;  %v930_v30 = vadd.f32 %v929_v26, %v928_v24  ;;  %v942_v31 = vadd.f32 %v941_v27, %v940_v25  ;;  %v931_v32 = vpop.f32.mrb[6].mxu0  ;;  %v943_v33 = vpop.f32.mrb[6].mxu1 }
 0x10e   : > { %v932_v34 = vpop.f32.mrb[7].mxu0  ;;  %v944_v35 = vpop.f32.mrb[7].mxu1 }
 0x10f   : > { %887 = vst [vmem:[%s181_s9] sm:$0xff] %v886_v28   ;;  %904 = vst [vmem:[%s181_s9 + $0x10] sm:$0xff] %v896_v29   ;;  %v688_v36 = vadd.f32 %v930_v30, %v839_v5  ;;  %v704_v37 = vadd.f32 %v942_v31, %v839_v5  ;;  %v933_v38 = vadd.f32 %v932_v34, %v931_v32 }
 0x110   : > { %v945_v39 = vadd.f32 %v944_v35, %v943_v33 }
 0x111   : > { %v691_v40 = vadd.f32 %v933_v38, %v839_v5  ;;  %v712_v42 = vmax.f32 %v688_v36, 0.0  ;;  %v716_v43 = vmax.f32 %v704_v37, 0.0 }
 0x112   : > { %v707_v41 = vadd.f32 %v945_v39, %v839_v5 }
 0x113   : > { %v713_v44 = vmax.f32 %v691_v40, 0.0 }
 0x114   : > { %v717_v45 = vmax.f32 %v707_v41, 0.0 }
 0x115   : > { %v891_v46 = vpack.c.bf16 %v713_v44, %v712_v42 }
 0x116   : > { %v901_v47 = vpack.c.bf16 %v717_v45, %v716_v43 }
 0x117   : > { %903 = vst [vmem:[%s181_s9 + $0x8] sm:$0xff] %v891_v46  }
 0x118   : > { %905 = vst [vmem:[%s181_s9 + $0x18] sm:$0xff] %v901_v47  }
 0x119 PF: > { %s19_s17 = sadd.s32 1, %s1005_s17  }
 0x11a   : > { %p16_p4 = scmp.ge.s32.totalorder %s19_s17, 4  }
 0x11c   :  { %18 = sbr.rel (!%p16_p4) target bundleno = 3 (0x3), region = 92 }

// kernel: _lambda_.17
= control target key start
LH: loop header
LB: loop body
LE: loop exit
PB: predicated region body
PF: predicated region fallthrough
CT: control target
= control target key end

     0   :  { %s641_s17 = smov 0   ;;  %s715_s0 = inlined_call_operand.vmem [shape: bf16[256,128], index: 0, kind: input, shape index: {}]   ;;  %s716_s1 = inlined_call_operand.vmem [shape: f32[1,128], index: 1, kind: input, shape index: {}]   ;;  %s717_s2 = inlined_call_operand.vmem [shape: bf16[32,144], index: 2, kind: input, shape index: {}]   ;;  %s718_s3 = inlined_call_operand.<no memory space> [shape: bf16[], index: 3, kind: input, shape index: {}]   ;;  %s719_s4 = inlined_call_operand.vmem [shape: bf16[32,128], index: 4, kind: output, shape index: {}]  }
   0x1   :  { %v9_v0 = vstv %s718_s3 }
   0x2   :  { %v639_v1 = vunpack.i.l.bf16 %v9_v0 }
   0x3 LB: > { %s508_s18 = sadd.s32 4294967295, %s608_s17   ;;  %p512_p0 = scmp.ge.s32.totalorder %s608_s17, 1  ;;  %s608_s17 = sphi %s641_s17, %s19_s17  }
   0x4   : > { %p145_p1 = scmp.lt.s32.totalorder %s608_s17, 3 }
   0x6   : > { %p146_p2 = pnand %p512_p0, %p145_p1 }
   0x8   : > { %149 = sbr.rel (%p146_p2) target bundleno = 272 (0x110), region = 32 }
   0xf   : > { %v583_v2 = vld [vmem:[%s715_s0 + $0x40] sm:$0xff]   ;;  %s513_s3 = sshll.u32 %s508_s18, 1  ;;  %v585_v4 = vld [vmem:[%s715_s0 + $0x48] sm:$0xff]   ;;  %v207_v6 = vlaneseq  ;;  %v587_v7 = vld [vmem:[%s715_s0 + $0x50] sm:$0xff]   ;;  %v610_v25 = vmov 0.0  }
  0x10   : > { %v584_v3 = vld [vmem:[%s715_s0] sm:$0xff]   ;;  %552 = vmatprep.subr.bf16.mxu0 %v583_v2  ;;  %p171_p3 = scmp.lt.s32.totalorder %s513_s3, 3  ;;  %v586_v5 = vld [vmem:[%s715_s0 + $0x8] sm:$0xff]   ;;  %v588_v8 = vld [vmem:[%s715_s0 + $0x10] sm:$0xff]  }
  0x11   : > { %553 = vmatpush3.bf16.msra.mxu0 %v584_v3  ;;  %v208_v9 = vand.u32 127, %v207_v6  ;;  %v589_v10 = vld [vmem:[%s715_s0 + $0x58] sm:$0xff]   ;;  %v591_v13 = vld [vmem:[%s715_s0 + $0x60] sm:$0xff]   ;;  %v593_v15 = vld [vmem:[%s715_s0 + $0x68] sm:$0xff]  }
  0x12   : > { %554 = vmatprep.subr.bf16.mxu0 %v585_v4  ;;  %s721_s3 = smov (!%p171_p3, %s513_s3), 3  ;;  %v590_v11 = vld [vmem:[%s715_s0 + $0x18] sm:$0xff]   ;;  %v592_v14 = vld [vmem:[%s715_s0 + $0x20] sm:$0xff]   ;;  %v594_v21 = vld [vmem:[%s715_s0 + $0x28] sm:$0xff]  }
  0x13   : > { %s544_s7 = sshll.u32 %s721_s3, 3  ;;  %v209_v12 = vadd.s32 128, %v208_v9  ;;  %v595_v24 = vld [vmem:[%s715_s0 + $0x70] sm:$0xff]   ;;  %v597_v29 = vld [vmem:[%s715_s0 + $0x78] sm:$0xff]   ;;  %v521_v34 = vld [vmem:[%s716_s1] ss:$0 sm:$0xff] }
  0x14   : > { %s175_s14 = scalar_lea.vmem %s717_s2, %s544_s7  ;;  %v596_v28 = vld [vmem:[%s715_s0 + $0x30] sm:$0xff]   ;;  %v598_v30 = vld [vmem:[%s715_s0 + $0x38] sm:$0xff]   ;;  %s517_s6 = sshll.u32 %s721_s3, 2 }
  0x15   : > { %555 = vmatpush3.bf16.msra.mxu0 %v586_v5  ;;  %vm210_vm0 = vcmp.lt.s32.totalorder %v209_v12, 144  ;;  %v183_v16 = vld [vmem:[%s175_s14] sm:$0xf]  ;;  %v518_v17 = vld [vmem:[%s175_s14 + $0x4] ss:$8 sps:$4 sm:$0xff]   ;;  %s181_s9 = scalar_lea.vmem %s719_s4, %s517_s6 }
  0x16   : > { %556 = vmatprep.subr.bf16.mxu0 %v587_v7  ;;  %v519_v18 = vld [vmem:[%s175_s14 + $0x8] sm:$0xf]  ;;  %193 = vst [vmem:[#allocation7] sm:$0xf] %v183_v16  ;;  %v205_v19 = vunpack.c.l.bf16 %v518_v17  ;;  %v240_v20 = vunpack.c.h.bf16 %v518_v17 }
  0x17   : > { %228 = vst [vmem:[#allocation7 + $0x8] sm:$0xf] %v519_v18 }
  0x18   : > { %v211_v22 = vsel %vm210_vm0, %v205_v19, %v639_v1  ;;  %v246_v23 = vsel %vm210_vm0, %v240_v20, %v639_v1 }
  0x19   : > { %557 = vmatpush3.bf16.msra.mxu0 %v588_v8  ;;  %v213_v26 = vpack.c.bf16 %v610_v25, %v211_v22  ;;  %v248_v27 = vpack.c.bf16 %v610_v25, %v246_v23 }
  0x1a   : > { %558 = vmatprep.subr.bf16.mxu0 %v589_v10 }
  0x1b   : > { %215 = vst [vmem:[#allocation7 + $0x4] sm:$0xf] %v213_v26  ;;  %250 = vst [vmem:[#allocation7 + $0xc] sm:$0xf] %v248_v27 }
  0x1d   : > { %559 = vmatpush3.bf16.msra.mxu0 %v590_v11 }
  0x1e   : > { %560 = vmatprep.subr.bf16.mxu0 %v591_v13  ;;  %v599_v31 = vld [vmem:[#allocation7] ss:$8 sps:$4 sm:$0xff]  }
  0x21   : > { %561 = vmatpush3.bf16.msra.mxu0 %v592_v14 }
  0x22   : > { %562 = vmatprep.subr.bf16.mxu0 %v593_v15  ;;  %v601_v32 = vld [vmem:[#allocation7 + $0x4] ss:$8 sps:$4 sm:$0xff]  }
  0x23   : > { %431 = vmatprep.mubr.bf16.mxu0 %v601_v32 }
  0x25   : > { %563 = vmatpush3.bf16.msra.mxu0 %v594_v21 }
  0x26   : > { %564 = vmatprep.subr.bf16.mxu0 %v595_v24 }
  0x29   : > { %565 = vmatpush3.bf16.msra.mxu0 %v596_v28 }
  0x2a   : > { %566 = vmatprep.subr.bf16.mxu0 %v597_v29 }
  0x2d   : > { %567 = vmatpush3.bf16.msra.mxu0 %v598_v30 }
  0x30   : > { %432 = vmatmul.mubr.bf16.vlgmr.msra.gmra.mrb[0].mxu0 %v599_v31 }
 0x103   : > { %v568_v33 = vpop.f32.mrb[0].mxu0 }
 0x104   : > { %v569_v35 = vpop.f32.mrb[1].mxu0 }
 0x105   : > { %v570_v36 = vadd.f32 %v569_v35, %v568_v33  ;;  %v571_v37 = vpop.f32.mrb[2].mxu0 }
 0x106   : > { %v572_v38 = vpop.f32.mrb[3].mxu0 }
 0x107   : > { %v434_v39 = vadd.f32 %v570_v36, %v521_v34  ;;  %v573_v40 = vadd.f32 %v572_v38, %v571_v37 }
 0x109   : > { %v437_v41 = vadd.f32 %v573_v40, %v521_v34  ;;  %v440_v42 = vmax.f32 %v434_v39, 0.0 }
 0x10b   : > { %v441_v43 = vmax.f32 %v437_v41, 0.0 }
 0x10d   : > { %v550_v44 = vpack.c.bf16 %v441_v43, %v440_v42 }
 0x10f   : > { %551 = vst [vmem:[%s181_s9] sm:$0xff] %v550_v44  }
 0x110 PF: > { %s19_s17 = sadd.s32 1, %s608_s17  }
 0x111   : > { %p16_p4 = scmp.ge.s32.totalorder %s19_s17, 4  }
 0x113   :  { %18 = sbr.rel (!%p16_p4) target bundleno = 3 (0x3), region = 68 }

// kernel: _lambda_.16
= control target key start
LH: loop header
LB: loop body
LE: loop exit
PB: predicated region body
PF: predicated region fallthrough
CT: control target
= control target key end

     0   :  { %s835_s17 = smov 0   ;;  %s944_s0 = inlined_call_operand.vmem [shape: bf16[384,128], index: 0, kind: input, shape index: {}]   ;;  %s945_s1 = inlined_call_operand.vmem [shape: f32[1,128], index: 1, kind: input, shape index: {}]   ;;  %s946_s2 = inlined_call_operand.vmem [shape: bf16[32,288], index: 2, kind: input, shape index: {}]   ;;  %s947_s3 = inlined_call_operand.<no memory space> [shape: bf16[], index: 3, kind: input, shape index: {}]   ;;  %s948_s4 = inlined_call_operand.vmem [shape: bf16[32,128], index: 4, kind: output, shape index: {}]  }
   0x1   :  { %v9_v0 = vstv %s947_s3 }
   0x2   :  { %v833_v1 = vunpack.i.l.bf16 %v9_v0 }
   0x3 LB: > { %s647_s18 = sadd.s32 4294967295, %s801_s17   ;;  %p651_p0 = scmp.ge.s32.totalorder %s801_s17, 1  ;;  %s801_s17 = sphi %s835_s17, %s19_s17  }
   0x4   : > { %p145_p1 = scmp.lt.s32.totalorder %s801_s17, 3 }
   0x6   : > { %p146_p2 = pnand %p651_p0, %p145_p1 }
   0x8   : > { %149 = sbr.rel (%p146_p2) target bundleno = 274 (0x112), region = 32 }
   0xf   : > { %v767_v2 = vld [vmem:[%s944_s0 + $0x40] sm:$0xff]   ;;  %v803_v4 = vmov 0.0   ;;  %v770_v6 = vld [vmem:[%s944_s0 + $0x48] sm:$0xff]   ;;  %s652_s28 = sshll.u32 %s647_s18, 1  ;;  %v773_v9 = vld [vmem:[%s944_s0 + $0x50] sm:$0xff]   ;;  %vm804_vm0 = vmmov 0   ;;  %v220_v15 = vlaneseq }
  0x10   : > { %v768_v3 = vld [vmem:[%s944_s0] sm:$0xff]   ;;  %736 = vmatprep.subr.bf16.mxu1 %v803_v4  ;;  %705 = vmatprep.subr.bf16.mxu0 %v767_v2  ;;  %v771_v7 = vld [vmem:[%s944_s0 + $0x8] sm:$0xff]   ;;  %v774_v10 = vld [vmem:[%s944_s0 + $0x10] sm:$0xff]   ;;  %p171_p3 = scmp.lt.s32.totalorder %s652_s28, 3 }
  0x11   : > { %v769_v5 = vld [vmem:[%s944_s0 + $0x80] sm:$0xff]   ;;  %706 = vmatpush3.bf16.msra.mxu0 %v768_v3  ;;  %v772_v8 = vld [vmem:[%s944_s0 + $0x88] sm:$0xff]   ;;  %v775_v11 = vld [vmem:[%s944_s0 + $0x90] sm:$0xff]   ;;  %752 = vmatprep.mubr.msk.bf16.mxu1 %vm804_vm0, %v803_v4  ;;  %v221_v19 = vand.u32 127, %v220_v15 }
  0x12   : > { %737 = vmatpush3.bf16.msra.mxu1 %v769_v5  ;;  %707 = vmatprep.subr.bf16.mxu0 %v770_v6  ;;  %v776_v12 = vld [vmem:[%s944_s0 + $0x58] sm:$0xff]   ;;  %v779_v16 = vld [vmem:[%s944_s0 + $0x60] sm:$0xff]   ;;  %s950_s28 = smov (!%p171_p3, %s652_s28), 3  ;;  %v782_v20 = vld [vmem:[%s944_s0 + $0x68] sm:$0xff]  }
  0x13   : > { %738 = vmatprep.subr.bf16.mxu1 %v803_v4  ;;  %v777_v13 = vld [vmem:[%s944_s0 + $0x18] sm:$0xff]   ;;  %v780_v17 = vld [vmem:[%s944_s0 + $0x20] sm:$0xff]   ;;  %s756_s25 = smul.u32 12, %s950_s28  ;;  %v783_v21 = vld [vmem:[%s944_s0 + $0x28] sm:$0xff]   ;;  %v222_v23 = vadd.s32 256, %v221_v19  ;;  %s655_s22 = sshll.u32 %s950_s28, 2 }
  0x14   : > { %v778_v14 = vld [vmem:[%s944_s0 + $0x98] sm:$0xff]   ;;  %v781_v18 = vld [vmem:[%s944_s0 + $0xa0] sm:$0xff]   ;;  %v784_v22 = vld [vmem:[%s944_s0 + $0xa8] sm:$0xff]  }
  0x15   : > { %708 = vmatpush3.bf16.msra.mxu0 %v771_v7  ;;  %v785_v24 = vld [vmem:[%s944_s0 + $0x70] sm:$0xff]   ;;  %s175_s9 = scalar_lea.vmem %s946_s2, %s756_s25  ;;  %v788_v27 = vld [vmem:[%s944_s0 + $0x78] sm:$0xff]   ;;  %vm223_vm1 = vcmp.lt.s32.totalorder %v222_v23, 288  ;;  %v661_v47 = vld [vmem:[%s945_s1] ss:$0 sm:$0xff]  ;;  %s181_s25 = scalar_lea.vmem %s948_s4, %s655_s22 }
  0x16   : > { %739 = vmatpush3.bf16.msra.mxu1 %v772_v8  ;;  %709 = vmatprep.subr.bf16.mxu0 %v773_v9  ;;  %v786_v25 = vld [vmem:[%s944_s0 + $0x30] sm:$0xff]   ;;  %v183_v28 = vld [vmem:[%s175_s9] sm:$0xff]   ;;  %v657_v29 = vld [vmem:[%s175_s9 + $0x8] sm:$0xff]  }
  0x17   : > { %740 = vmatprep.subr.bf16.mxu1 %v803_v4  ;;  %v787_v26 = vld [vmem:[%s944_s0 + $0xb0] sm:$0xff]   ;;  %193 = vst [vmem:[#allocation7] sm:$0xff] %v183_v28   ;;  %v218_v31 = vunpack.c.l.bf16 %v657_v29  ;;  %v697_v32 = vunpack.c.h.bf16 %v657_v29  ;;  %v789_v36 = vld [vmem:[%s944_s0 + $0x38] sm:$0xff]  }
  0x18   : > { %v659_v30 = vld [vmem:[%s175_s9 + $0x10] sm:$0xf]  ;;  %v660_v33 = vld [vmem:[%s175_s9 + $0x14] sm:$0xf]  ;;  %v793_v39 = vld [vmem:[%s944_s0 + $0xb8] sm:$0xff]  }
  0x19   : > { %710 = vmatpush3.bf16.msra.mxu0 %v774_v10  ;;  %254 = vst [vmem:[#allocation7 + $0x10] sm:$0xf] %v659_v30  ;;  %v266_v34 = vunpack.c.l.bf16 %v660_v33  ;;  %v224_v35 = vsel %vm223_vm1, %v218_v31, %v833_v1 }
  0x1a   : > { %741 = vmatpush3.bf16.msra.mxu1 %v775_v11  ;;  %711 = vmatprep.subr.bf16.mxu0 %v776_v12  ;;  %v698_v37 = vpack.c.bf16 %v697_v32, %v224_v35 }
  0x1b   : > { %742 = vmatprep.subr.bf16.mxu1 %v803_v4  ;;  %v272_v38 = vsel %vm223_vm1, %v266_v34, %v833_v1 }
  0x1c   : > { %v274_v40 = vpack.c.bf16 %v803_v4, %v272_v38  ;;  %699 = vst [vmem:[#allocation7 + $0x8] sm:$0xff] %v698_v37  }
  0x1d   : > { %712 = vmatpush3.bf16.msra.mxu0 %v777_v13 }
  0x1e   : > { %743 = vmatpush3.bf16.msra.mxu1 %v778_v14  ;;  %713 = vmatprep.subr.bf16.mxu0 %v779_v16  ;;  %276 = vst [vmem:[#allocation7 + $0x14] sm:$0xf] %v274_v40 }
  0x1f   : > { %744 = vmatprep.subr.bf16.mxu1 %v803_v4 }
  0x20   : > { %v792_v42 = vld [vmem:[#allocation7 + $0x4] ss:$12 sps:$4 sm:$0xff]  }
  0x21   : > { %714 = vmatpush3.bf16.msra.mxu0 %v780_v17  ;;  %529 = vmatprep.mubr.bf16.mxu0 %v792_v42 }
  0x22   : > { %745 = vmatpush3.bf16.msra.mxu1 %v781_v18  ;;  %715 = vmatprep.subr.bf16.mxu0 %v782_v20 }
  0x23   : > { %746 = vmatprep.subr.bf16.mxu1 %v803_v4  ;;  %v790_v41 = vld [vmem:[#allocation7] ss:$12 sps:$4 sm:$0xff]  }
  0x25   : > { %716 = vmatpush3.bf16.msra.mxu0 %v783_v21  ;;  %v794_v43 = vld [vmem:[#allocation7 + $0x8] ss:$12 sps:$4 sm:$0xff]  }
  0x26   : > { %747 = vmatpush3.bf16.msra.mxu1 %v784_v22  ;;  %717 = vmatprep.subr.bf16.mxu0 %v785_v24 }
  0x27   : > { %748 = vmatprep.subr.bf16.mxu1 %v803_v4 }
  0x29   : > { %718 = vmatpush3.bf16.msra.mxu0 %v786_v25 }
  0x2a   : > { %749 = vmatpush3.bf16.msra.mxu1 %v787_v26  ;;  %719 = vmatprep.subr.bf16.mxu0 %v788_v27 }
  0x2b   : > { %750 = vmatprep.subr.bf16.mxu1 %v803_v4 }
  0x2d   : > { %720 = vmatpush3.bf16.msra.mxu0 %v789_v36 }
  0x2e   : > { %751 = vmatpush3.bf16.msra.mxu1 %v793_v39 }
  0x30   : > { %530 = vmatmul.mubr.bf16.vlgmr.msra.gmra.mrb[0].mxu0 %v790_v41 }
  0x31   : > { %753 = vmatmul.mubr.bf16.vlgmr.msra.gmra.mrb[0].mxu1 %v794_v43 }
 0x103   : > { %v721_v44 = vpop.f32.mrb[0].mxu0 }
 0x104   : > { %v572_v45 = vpop.f32.mrb[0].mxu1  ;;  %v722_v46 = vpop.f32.mrb[1].mxu0 }
 0x105   : > { %v754_v48 = vpop.f32.mrb[1].mxu1  ;;  %v723_v49 = vadd.f32 %v722_v46, %v721_v44  ;;  %v724_v50 = vpop.f32.mrb[2].mxu0 }
 0x106   : > { %v575_v51 = vpop.f32.mrb[2].mxu1  ;;  %v725_v52 = vpop.f32.mrb[3].mxu0 }
 0x107   : > { %v755_v53 = vpop.f32.mrb[3].mxu1  ;;  %v532_v54 = vadd.f32 %v723_v49, %v661_v47  ;;  %v726_v55 = vadd.f32 %v725_v52, %v724_v50 }
 0x109   : > { %v573_v56 = vadd.f32 %v572_v45, %v532_v54  ;;  %v535_v57 = vadd.f32 %v726_v55, %v661_v47 }
 0x10b   : > { %v576_v58 = vadd.f32 %v575_v51, %v535_v57  ;;  %v579_v59 = vmax.f32 %v573_v56, 0.0 }
 0x10d   : > { %v580_v60 = vmax.f32 %v576_v58, 0.0 }
 0x10f   : > { %v703_v61 = vpack.c.bf16 %v580_v60, %v579_v59 }
 0x111   : > { %704 = vst [vmem:[%s181_s25] sm:$0xff] %v703_v61  }
 0x112 PF: > { %s19_s17 = sadd.s32 1, %s801_s17  }
 0x113   : > { %p16_p4 = scmp.ge.s32.totalorder %s19_s17, 4  }
 0x115   :  { %18 = sbr.rel (!%p16_p4) target bundleno = 3 (0x3), region = 72 }

</bundles_post_ra>
